<compile_context>
chip_gen: v5e
topology: v5e:2x2
jax: 0.10.0
libtpu: 0.0.40
codegen_flags: <defaults>
</compile_context>

<pallas_src>
import jax
import jax.numpy as jnp
from jax.experimental import pallas as pl
from jax.experimental.pallas import tpu as pltpu


# ----------------------------------------------------------------------------
# Kernel
# ----------------------------------------------------------------------------
def _attention_kernel(feats_ref, hidden_ref,
                      wvT_ref, bv_ref, whT_ref, bh_ref, ws_ref, bs_ref,
                      ctx_ref, alpha_ref):
    # feats_ref : (Bt, N, F) bf16     hidden_ref : (Bt, H) bf16
    # wvT_ref   : (F, A)     bf16     bv_ref     : (1, A)  f32
    # whT_ref   : (H, A)     bf16     bh_ref     : (1, A)  f32
    # ws_ref    : (1, A)     f32      bs_ref     : (1, 1)  f32
    # ctx_ref   : (Bt, F)    f32      alpha_ref  : (Bt, N) f32
    Bt, N, F = feats_ref.shape
    A = wvT_ref.shape[1]

    f = feats_ref[...]                                   # (Bt, N, F) bf16
    f2 = f.reshape(Bt * N, F)                            # big MXU M dimension

    # v_proj(feats): one (Bt*N, F) @ (F, A) bf16 MXU matmul, f32 accumulate.
    pv = jnp.dot(f2, wvT_ref[...],
                 preferred_element_type=jnp.float32)     # (Bt*N, A) f32
    pv = pv.reshape(Bt, N, A) + bv_ref[...].reshape(1, 1, A)

    # h_proj(hidden): (Bt, H) @ (H, A) bf16 MXU matmul, broadcast over N.
    ph = jnp.dot(hidden_ref[...], whT_ref[...],
                 preferred_element_type=jnp.float32) + bh_ref[...]   # (Bt, A)

    e = jnp.tanh(pv + ph[:, None, :])                    # (Bt, N, A) f32

    # score(e): VPU broadcast-multiply + lane (XLU) reduce over A.
    # Avoids an (M, A) @ (A, 1) MXU matvec (1 output column, bad cadence)
    # and the sublane->lane relayout of its (Bt*N, 1) result.
    scores = jnp.sum(e * ws_ref[...].reshape(1, 1, A), axis=-1) + bs_ref[...]  # (Bt, N)

    # Softmax over the region axis (last / lane axis), per batch row.
    m = jnp.max(scores, axis=-1, keepdims=True)          # (Bt, 1)
    p = jnp.exp(scores - m)                              # (Bt, N)
    denom = jnp.sum(p, axis=-1, keepdims=True)           # (Bt, 1)
    alpha = p / denom                                    # exact: rows sum to 1

    # context[b, :] = sum_n alpha[b, n] * feats[b, n, :]
    # VPU multiply + sublane (XLU) reduce; avoids Bt separate M=1 MXU matmuls.
    ctx = jnp.sum(alpha[:, :, None] * f.astype(jnp.float32), axis=1)  # (Bt, F)

    ctx_ref[...] = ctx.astype(ctx_ref.dtype)
    alpha_ref[...] = alpha.astype(alpha_ref.dtype)


# ----------------------------------------------------------------------------
# VMEM budgeting (generation-aware)
# ----------------------------------------------------------------------------
def _round_up(x, m):
    return ((int(x) + m - 1) // m) * m


def _vmem_capacity_bytes():
    """Physical VMEM per TensorCore; conservative fallback if the query fails."""
    try:
        info = pltpu.get_tpu_info()
        cap = getattr(info, "vmem_capacity_bytes", None)
        if cap:
            return int(cap)
    except Exception:
        pass
    return 64 * 1024 * 1024   # v7x per-TC VMEM; safe lower bound for v5e/v6e too


def _est_vmem_bytes(Bt, N, F, H, A):
    """Estimate peak VMEM for one grid step: tiles, weights and intermediates."""
    bf16, f32 = 2, 4
    io = (2 * Bt * N * F * bf16        # feats tile (double-buffered)
          + 2 * Bt * H * bf16          # hidden tile (double-buffered)
          + 2 * Bt * F * f32           # context output (double-buffered)
          + 2 * Bt * N * f32)          # alpha output (double-buffered)
    weights = (F * A + H * A) * bf16 + (3 * A + 1) * f32     # single-buffered constants
    inter = (2 * Bt * N * A * f32      # pv and e
             + Bt * N * F * f32        # alpha*feats product before the N-reduce
             + 4 * Bt * N * f32)       # scores / p / alpha / misc
    return io + weights + inter


def _select_batch_tile(B, N, F, H, A, budget):
    """Largest batch tile (multiple of 8, <=512) whose estimate fits the budget."""
    b_pad8 = _round_up(B, 8)
    bt = _round_up(min(b_pad8, 512), 8)
    while bt > 8 and _est_vmem_bytes(bt, N, F, H, A) > budget:
        bt -= 8
    # Megacore: keep >= 2 grid steps when the batch allows it so
    # dimension_semantics=("parallel",) can shard across v7x's 2 TensorCores.
    if bt >= b_pad8 and b_pad8 >= 16:
        bt = min(bt, _round_up(b_pad8 // 2, 8))
    return max(8, bt)


# ----------------------------------------------------------------------------
# Parameter prep (hoisted out of the per-call path)
# ----------------------------------------------------------------------------
def prepare_attention_params(params):
    """Transpose / cast the weights once; call this at parameter-setup time."""
    A = params["wv"].shape[0]
    return {
        "wvT": jnp.asarray(params["wv"]).T.astype(jnp.bfloat16),   # (F, A)
        "whT": jnp.asarray(params["wh"]).T.astype(jnp.bfloat16),   # (H, A)
        "bv": jnp.asarray(params["bv"], jnp.float32).reshape(1, A),
        "bh": jnp.asarray(params["bh"], jnp.float32).reshape(1, A),
        "ws": jnp.asarray(params["ws"], jnp.float32).reshape(1, A),
        "bs": jnp.asarray(params["bs"], jnp.float32).reshape(1, 1),
    }


# ----------------------------------------------------------------------------
# Wrapper
# ----------------------------------------------------------------------------
def attention_forward(feats, hidden, params, *, block_b=None):
    """feats: [B, N, F], hidden: [B, H] -> (context [B, F] f32, alpha [B, N] f32)."""
    B, N, F = feats.shape
    H = hidden.shape[1]

    # Accept either raw (wv/wh/ws/...) or pre-prepared (wvT/whT/...) params.
    prepped = params if "wvT" in params else prepare_attention_params(params)
    A = prepped["wvT"].shape[1]

    cap = _vmem_capacity_bytes()
    budget = int(0.70 * cap)
    if block_b is None:
        Bt = _select_batch_tile(B, N, F, H, A, budget)
    else:
        Bt = max(8, _round_up(int(block_b), 8))
    B_pad = pl.cdiv(B, Bt) * Bt

    est = _est_vmem_bytes(Bt, N, F, H, A)
    vmem_limit = int(min(0.92 * cap, max(est + (8 << 20), 32 << 20)))
    # TODO(synk): if est > vmem_limit even at Bt=8 (huge F on v7x), switch to
    # an N-tiled online-softmax variant instead of relying on a bigger limit.

    # bf16 MXU operands (f32 accumulation inside the kernel).
    feats_c = feats.astype(jnp.bfloat16)
    hidden_c = hidden.astype(jnp.bfloat16)
    if B_pad != B:
        feats_c = jnp.pad(feats_c, ((0, B_pad - B), (0, 0), (0, 0)))
        hidden_c = jnp.pad(hidden_c, ((0, B_pad - B), (0, 0)))

    grid = (B_pad // Bt,)

    def build_specs(single_buffer_weights):
        def const_spec(shape):
            nd = len(shape)
            kw = {}
            if single_buffer_weights:
                # Constant index_map across the grid -> one buffer is enough;
                # reclaims the weight double-buffer VMEM for a bigger Bt.
                kw["pipeline_mode"] = pl.Buffered(1)
            return pl.BlockSpec(shape, lambda *_: (0,) * nd, **kw)

        in_specs = [
            pl.BlockSpec((Bt, N, F), lambda b: (b, 0, 0)),   # feats tile
            pl.BlockSpec((Bt, H), lambda b: (b, 0)),         # hidden tile
            const_spec((F, A)),                              # Wv^T
            const_spec((1, A)),                              # bv
            const_spec((H, A)),                              # Wh^T
            const_spec((1, A)),                              # bh
            const_spec((1, A)),                              # score weight
            const_spec((1, 1)),                              # score bias
        ]
        out_specs = [
            pl.BlockSpec((Bt, F), lambda b: (b, 0)),         # context (sublane-dense)
            pl.BlockSpec((Bt, N), lambda b: (b, 0)),         # alpha   (sublane-dense)
        ]
        return in_specs, out_specs

    def run(single_buffer_weights):
        in_specs, out_specs = build_specs(single_buffer_weights)
        grid_spec = pltpu.PrefetchScalarGridSpec(
            num_scalar_prefetch=0,
            grid=grid,
            in_specs=in_specs,
            out_specs=out_specs,
        )
        return pl.pallas_call(
            _attention_kernel,
            out_shape=(
                jax.ShapeDtypeStruct((B_pad, F), jnp.float32),
                jax.ShapeDtypeStruct((B_pad, N), jnp.float32),
            ),
            grid_spec=grid_spec,
            compiler_params=pltpu.CompilerParams(
                dimension_semantics=("parallel",),
                vmem_limit_bytes=vmem_limit),
        )(feats_c, hidden_c,
          prepped["wvT"], prepped["bv"], prepped["whT"], prepped["bh"],
          prepped["ws"], prepped["bs"])

    try:
        ctx, alpha = run(True)
    except Exception:
        # Fallback if this JAX build rejects pipeline_mode=pl.Buffered(1):
        # default double-buffered constants (slightly more VMEM, same result).
        ctx, alpha = run(False)

    return ctx[:B], alpha[:B]


# ----------------------------------------------------------------------------
# Reference + test
# ----------------------------------------------------------------------------
def _reference(feats, hidden, params):
    pv = jnp.einsum("bnf,af->bna", feats, params["wv"]) + params["bv"]
    ph = (hidden @ params["wh"].T + params["bh"])[:, None, :]
    e = jnp.tanh(pv + ph)
    scores = jnp.einsum("bna,a->bn", e, params["ws"]) + params["bs"]
    alpha = jax.nn.softmax(scores, axis=1)
    context = jnp.sum(alpha[..., None] * feats, axis=1)
    return context, alpha


if __name__ == "__main__":
    key = jax.random.PRNGKey(0)
    B, N = 2, 8
    feat_dim, hid_dim, attn_dim = 32, 16, 32

    k = jax.random.split(key, 8)
    feats = jax.random.normal(k[0], (B, N, feat_dim), dtype=jnp.float32)
    hidden = jax.random.normal(k[1], (B, hid_dim), dtype=jnp.float32)

    # Deterministic parameter init (mimicking nn.Linear's fan-in uniform).
    def lin_init(kw, kb, out_d, in_d):
        bound = 1.0 / jnp.sqrt(in_d)
        w = jax.random.uniform(kw, (out_d, in_d), jnp.float32, -bound, bound)
        b = jax.random.uniform(kb, (out_d,), jnp.float32, -bound, bound)
        return w, b

    wv, bv = lin_init(k[2], k[3], attn_dim, feat_dim)
    wh, bh = lin_init(k[4], k[5], attn_dim, hid_dim)
    ws2d, bs = lin_init(k[6], k[7], 1, attn_dim)

    params = {
        "wv": wv, "bv": bv,
        "wh": wh, "bh": bh,
        "ws": ws2d[0], "bs": bs[0],
    }

    # Hoist the transpose/cast out of the per-call path.
    prepped = prepare_attention_params(params)

    ctx, alpha = attention_forward(feats, hidden, prepped)
    jax.block_until_ready((ctx, alpha))

    ctx_ref, alpha_ref = _reference(feats, hidden, params)
    # bf16 MXU operands (f32 accumulation) -> tolerance relaxed to ~2e-2.
    assert jnp.allclose(ctx, ctx_ref, atol=2e-2, rtol=2e-2), \
        float(jnp.max(jnp.abs(ctx - ctx_ref)))
    assert jnp.allclose(alpha, alpha_ref, atol=2e-2, rtol=2e-2), \
        float(jnp.max(jnp.abs(alpha - alpha_ref)))
    # Exact divide in the softmax: rows of alpha sum to 1.
    assert jnp.allclose(jnp.sum(alpha, axis=1), 1.0, atol=1e-5)
    print("KERNEL_OK")
</pallas_src>

<mosaic_0001>
module attributes {stable_mosaic.version = 11 : i64} {
  func.func @_attention_kernel(%arg0: i32, %arg1: memref<8x8x32xbf16, #tpu.memory_space<vmem>>, %arg2: memref<8x16xbf16, #tpu.memory_space<vmem>>, %arg3: memref<32x32xbf16, #tpu.memory_space<vmem>>, %arg4: memref<1x32xf32, #tpu.memory_space<vmem>>, %arg5: memref<16x32xbf16, #tpu.memory_space<vmem>>, %arg6: memref<1x32xf32, #tpu.memory_space<vmem>>, %arg7: memref<1x32xf32, #tpu.memory_space<vmem>>, %arg8: memref<1x1xf32, #tpu.memory_space<vmem>>, %arg9: memref<8x32xf32, #tpu.memory_space<vmem>>, %arg10: memref<8x8xf32, #tpu.memory_space<vmem>>) attributes {dimension_semantics = [#tpu.dimension_semantics<parallel>], iteration_bounds = array<i64: 1>, scalar_prefetch = 0 : i64, scratch_operands = 0 : i64, tpu.core_type = #tpu.core_type<tc>, window_params = [{transform_indices = @transform_0, window_bounds = array<i64: 8, 8, 32>}, {transform_indices = @transform_1, window_bounds = array<i64: 8, 16>}, {pipeline_mode = #tpu.pipeline_mode<synchronous>, transform_indices = @transform_2, window_bounds = array<i64: 32, 32>}, {pipeline_mode = #tpu.pipeline_mode<synchronous>, transform_indices = @transform_3, window_bounds = array<i64: 1, 32>}, {pipeline_mode = #tpu.pipeline_mode<synchronous>, transform_indices = @transform_4, window_bounds = array<i64: 16, 32>}, {pipeline_mode = #tpu.pipeline_mode<synchronous>, transform_indices = @transform_5, window_bounds = array<i64: 1, 32>}, {pipeline_mode = #tpu.pipeline_mode<synchronous>, transform_indices = @transform_6, window_bounds = array<i64: 1, 32>}, {pipeline_mode = #tpu.pipeline_mode<synchronous>, transform_indices = @transform_7, window_bounds = array<i64: 1, 1>}, {transform_indices = @transform_8, window_bounds = array<i64: 8, 32>}, {transform_indices = @transform_9, window_bounds = array<i64: 8, 8>}]} {
    %c0 = arith.constant 0 : index
    %c0_0 = arith.constant 0 : index
    %c0_1 = arith.constant 0 : index
    %0 = vector.load %arg1[%c0, %c0_0, %c0_1] : memref<8x8x32xbf16, #tpu.memory_space<vmem>>, vector<8x8x32xbf16>
    %1 = vector.shape_cast %0 : vector<8x8x32xbf16> to vector<64x32xbf16>
    %c0_2 = arith.constant 0 : index
    %c0_3 = arith.constant 0 : index
    %2 = vector.load %arg3[%c0_2, %c0_3] : memref<32x32xbf16, #tpu.memory_space<vmem>>, vector<32x32xbf16>
    %cst = arith.constant dense<0.000000e+00> : vector<64x32xf32>
    %3 = tpu.matmul %1, %2, %cst {dimension_numbers = #tpu.dot_dimension_numbers<[1], [0], [0], [1], [0, 0, 1, 1], [], []>} : vector<64x32xbf16>, vector<32x32xbf16>, vector<64x32xf32> -> vector<64x32xf32>
    %4 = vector.shape_cast %3 : vector<64x32xf32> to vector<8x8x32xf32>
    %c0_4 = arith.constant 0 : index
    %c0_5 = arith.constant 0 : index
    %5 = vector.load %arg4[%c0_4, %c0_5] : memref<1x32xf32, #tpu.memory_space<vmem>>, vector<1x32xf32>
    %6 = vector.shape_cast %5 : vector<1x32xf32> to vector<1x1x32xf32>
    %7 = vector.broadcast %6 : vector<1x1x32xf32> to vector<8x8x32xf32>
    %8 = arith.addf %4, %7 : vector<8x8x32xf32>
    %c0_6 = arith.constant 0 : index
    %c0_7 = arith.constant 0 : index
    %9 = vector.load %arg2[%c0_6, %c0_7] : memref<8x16xbf16, #tpu.memory_space<vmem>>, vector<8x16xbf16>
    %c0_8 = arith.constant 0 : index
    %c0_9 = arith.constant 0 : index
    %10 = vector.load %arg5[%c0_8, %c0_9] : memref<16x32xbf16, #tpu.memory_space<vmem>>, vector<16x32xbf16>
    %cst_10 = arith.constant dense<0.000000e+00> : vector<8x32xf32>
    %11 = tpu.matmul %9, %10, %cst_10 {dimension_numbers = #tpu.dot_dimension_numbers<[1], [0], [0], [1], [0, 0, 1, 1], [], []>} : vector<8x16xbf16>, vector<16x32xbf16>, vector<8x32xf32> -> vector<8x32xf32>
    %c0_11 = arith.constant 0 : index
    %c0_12 = arith.constant 0 : index
    %12 = vector.load %arg6[%c0_11, %c0_12] : memref<1x32xf32, #tpu.memory_space<vmem>>, vector<1x32xf32>
    %13 = vector.broadcast %12 : vector<1x32xf32> to vector<8x32xf32>
    %14 = arith.addf %11, %13 : vector<8x32xf32>
    %15 = vector.shape_cast %14 : vector<8x32xf32> to vector<8x1x32xf32>
    %16 = vector.broadcast %15 : vector<8x1x32xf32> to vector<8x8x32xf32>
    %17 = arith.addf %8, %16 : vector<8x8x32xf32>
    %18 = math.tanh %17 : vector<8x8x32xf32>
    %c0_13 = arith.constant 0 : index
    %c0_14 = arith.constant 0 : index
    %19 = vector.load %arg7[%c0_13, %c0_14] : memref<1x32xf32, #tpu.memory_space<vmem>>, vector<1x32xf32>
    %20 = vector.shape_cast %19 : vector<1x32xf32> to vector<1x1x32xf32>
    %21 = vector.broadcast %20 : vector<1x1x32xf32> to vector<8x8x32xf32>
    %22 = arith.mulf %18, %21 : vector<8x8x32xf32>
    %cst_15 = arith.constant dense<0.000000e+00> : vector<8x8xf32>
    %23 = vector.multi_reduction <add>, %22, %cst_15 [2] : vector<8x8x32xf32> to vector<8x8xf32>
    %c0_16 = arith.constant 0 : index
    %c0_17 = arith.constant 0 : index
    %24 = vector.load %arg8[%c0_16, %c0_17] : memref<1x1xf32, #tpu.memory_space<vmem>>, vector<1x1xf32>
    %25 = vector.broadcast %24 : vector<1x1xf32> to vector<8x8xf32>
    %26 = arith.addf %23, %25 : vector<8x8xf32>
    %cst_18 = arith.constant dense<0xFF800000> : vector<8xf32>
    %27 = vector.multi_reduction <maximumf>, %26, %cst_18 [1] : vector<8x8xf32> to vector<8xf32>
    %28 = vector.shape_cast %27 : vector<8xf32> to vector<8x1xf32>
    %29 = vector.broadcast %28 : vector<8x1xf32> to vector<8x8xf32>
    %30 = arith.subf %26, %29 : vector<8x8xf32>
    %31 = math.exp %30 : vector<8x8xf32>
    %cst_19 = arith.constant dense<0.000000e+00> : vector<8xf32>
    %32 = vector.multi_reduction <add>, %31, %cst_19 [1] : vector<8x8xf32> to vector<8xf32>
    %33 = vector.shape_cast %32 : vector<8xf32> to vector<8x1xf32>
    %34 = vector.broadcast %33 : vector<8x1xf32> to vector<8x8xf32>
    %35 = arith.divf %31, %34 : vector<8x8xf32>
    %36 = vector.shape_cast %35 : vector<8x8xf32> to vector<8x8x1xf32>
    %37 = arith.extf %0 : vector<8x8x32xbf16> to vector<8x8x32xf32>
    %38 = vector.broadcast %36 : vector<8x8x1xf32> to vector<8x8x32xf32>
    %39 = arith.mulf %38, %37 : vector<8x8x32xf32>
    %cst_20 = arith.constant dense<0.000000e+00> : vector<8x32xf32>
    %40 = vector.multi_reduction <add>, %39, %cst_20 [1] : vector<8x8x32xf32> to vector<8x32xf32>
    %c0_21 = arith.constant 0 : index
    %c0_22 = arith.constant 0 : index
    %41 = vector.load %arg9[%c0_21, %c0_22] : memref<8x32xf32, #tpu.memory_space<vmem>>, vector<8x32xf32>
    tpu.vector_store %arg9[%c0_21, %c0_22], %40 {strides = array<i32>} : memref<8x32xf32, #tpu.memory_space<vmem>>, vector<8x32xf32>,
    %c0_23 = arith.constant 0 : index
    %c0_24 = arith.constant 0 : index
    %42 = vector.load %arg10[%c0_23, %c0_24] : memref<8x8xf32, #tpu.memory_space<vmem>>, vector<8x8xf32>
    tpu.vector_store %arg10[%c0_23, %c0_24], %35 {strides = array<i32>} : memref<8x8xf32, #tpu.memory_space<vmem>>, vector<8x8xf32>,
    return
  }
  func.func @transform_0(%arg0: i32) -> (i32, i32, i32) {
    %c0_i32 = arith.constant 0 : i32
    %c0_i32_0 = arith.constant 0 : i32
    %c0_i32_1 = arith.constant 0 : i32
    return %arg0, %c0_i32, %c0_i32_0 : i32, i32, i32
  }
  func.func @transform_1(%arg0: i32) -> (i32, i32) {
    %c0_i32 = arith.constant 0 : i32
    %c0_i32_0 = arith.constant 0 : i32
    return %arg0, %c0_i32 : i32, i32
  }
  func.func @transform_2(%arg0: i32) -> (i32, i32) {
    %c0_i32 = arith.constant 0 : i32
    %c0_i32_0 = arith.constant 0 : i32
    %c0_i32_1 = arith.constant 0 : i32
    return %c0_i32, %c0_i32_0 : i32, i32
  }
  func.func @transform_3(%arg0: i32) -> (i32, i32) {
    %c0_i32 = arith.constant 0 : i32
    %c0_i32_0 = arith.constant 0 : i32
    %c0_i32_1 = arith.constant 0 : i32
    return %c0_i32, %c0_i32_0 : i32, i32
  }
  func.func @transform_4(%arg0: i32) -> (i32, i32) {
    %c0_i32 = arith.constant 0 : i32
    %c0_i32_0 = arith.constant 0 : i32
    %c0_i32_1 = arith.constant 0 : i32
    return %c0_i32, %c0_i32_0 : i32, i32
  }
  func.func @transform_5(%arg0: i32) -> (i32, i32) {
    %c0_i32 = arith.constant 0 : i32
    %c0_i32_0 = arith.constant 0 : i32
    %c0_i32_1 = arith.constant 0 : i32
    return %c0_i32, %c0_i32_0 : i32, i32
  }
  func.func @transform_6(%arg0: i32) -> (i32, i32) {
    %c0_i32 = arith.constant 0 : i32
    %c0_i32_0 = arith.constant 0 : i32
    %c0_i32_1 = arith.constant 0 : i32
    return %c0_i32, %c0_i32_0 : i32, i32
  }
  func.func @transform_7(%arg0: i32) -> (i32, i32) {
    %c0_i32 = arith.constant 0 : i32
    %c0_i32_0 = arith.constant 0 : i32
    %c0_i32_1 = arith.constant 0 : i32
    return %c0_i32, %c0_i32_0 : i32, i32
  }
  func.func @transform_8(%arg0: i32) -> (i32, i32) {
    %c0_i32 = arith.constant 0 : i32
    %c0_i32_0 = arith.constant 0 : i32
    return %arg0, %c0_i32 : i32, i32
  }
  func.func @transform_9(%arg0: i32) -> (i32, i32) {
    %c0_i32 = arith.constant 0 : i32
    %c0_i32_0 = arith.constant 0 : i32
    return %arg0, %c0_i32 : i32, i32
  }
}

module attributes {stable_mosaic.version = 11 : i64} {
  func.func @_attention_kernel(%arg0: i32, %arg1: memref<8x8x32xbf16, #tpu.memory_space<vmem>>, %arg2: memref<8x16xbf16, #tpu.memory_space<vmem>>, %arg3: memref<32x32xbf16, #tpu.memory_space<vmem>>, %arg4: memref<1x32xf32, #tpu.memory_space<vmem>>, %arg5: memref<16x32xbf16, #tpu.memory_space<vmem>>, %arg6: memref<1x32xf32, #tpu.memory_space<vmem>>, %arg7: memref<1x32xf32, #tpu.memory_space<vmem>>, %arg8: memref<1x1xf32, #tpu.memory_space<vmem>>, %arg9: memref<8x32xf32, #tpu.memory_space<vmem>>, %arg10: memref<8x8xf32, #tpu.memory_space<vmem>>) attributes {dimension_semantics = [#tpu.dimension_semantics<parallel>], iteration_bounds = array<i64: 1>, scalar_prefetch = 0 : i64, scratch_operands = 0 : i64, tpu.core_type = #tpu.core_type<tc>, window_params = [{transform_indices = @transform_0, window_bounds = array<i64: 8, 8, 32>}, {transform_indices = @transform_1, window_bounds = array<i64: 8, 16>}, {pipeline_mode = #tpu.pipeline_mode<synchronous>, transform_indices = @transform_2, window_bounds = array<i64: 32, 32>}, {pipeline_mode = #tpu.pipeline_mode<synchronous>, transform_indices = @transform_3, window_bounds = array<i64: 1, 32>}, {pipeline_mode = #tpu.pipeline_mode<synchronous>, transform_indices = @transform_4, window_bounds = array<i64: 16, 32>}, {pipeline_mode = #tpu.pipeline_mode<synchronous>, transform_indices = @transform_5, window_bounds = array<i64: 1, 32>}, {pipeline_mode = #tpu.pipeline_mode<synchronous>, transform_indices = @transform_6, window_bounds = array<i64: 1, 32>}, {pipeline_mode = #tpu.pipeline_mode<synchronous>, transform_indices = @transform_7, window_bounds = array<i64: 1, 1>}, {transform_indices = @transform_8, window_bounds = array<i64: 8, 32>}, {transform_indices = @transform_9, window_bounds = array<i64: 8, 8>}]} {
    %c0 = arith.constant 0 : index
    %c0_0 = arith.constant 0 : index
    %c0_1 = arith.constant 0 : index
    %0 = vector.load %arg1[%c0, %c0_0, %c0_1] : memref<8x8x32xbf16, #tpu.memory_space<vmem>>, vector<8x8x32xbf16>
    %1 = vector.shape_cast %0 : vector<8x8x32xbf16> to vector<64x32xbf16>
    %c0_2 = arith.constant 0 : index
    %c0_3 = arith.constant 0 : index
    %2 = vector.load %arg3[%c0_2, %c0_3] : memref<32x32xbf16, #tpu.memory_space<vmem>>, vector<32x32xbf16>
    %cst = arith.constant dense<0.000000e+00> : vector<64x32xf32>
    %3 = tpu.matmul %1, %2, %cst {dimension_numbers = #tpu.dot_dimension_numbers<[1], [0], [0], [1], [0, 0, 1, 1], [], []>} : vector<64x32xbf16>, vector<32x32xbf16>, vector<64x32xf32> -> vector<64x32xf32>
    %4 = vector.shape_cast %3 : vector<64x32xf32> to vector<8x8x32xf32>
    %c0_4 = arith.constant 0 : index
    %c0_5 = arith.constant 0 : index
    %5 = vector.load %arg4[%c0_4, %c0_5] : memref<1x32xf32, #tpu.memory_space<vmem>>, vector<1x32xf32>
    %6 = vector.shape_cast %5 : vector<1x32xf32> to vector<1x1x32xf32>
    %7 = vector.broadcast %6 : vector<1x1x32xf32> to vector<8x8x32xf32>
    %8 = arith.addf %4, %7 : vector<8x8x32xf32>
    %c0_6 = arith.constant 0 : index
    %c0_7 = arith.constant 0 : index
    %9 = vector.load %arg2[%c0_6, %c0_7] : memref<8x16xbf16, #tpu.memory_space<vmem>>, vector<8x16xbf16>
    %c0_8 = arith.constant 0 : index
    %c0_9 = arith.constant 0 : index
    %10 = vector.load %arg5[%c0_8, %c0_9] : memref<16x32xbf16, #tpu.memory_space<vmem>>, vector<16x32xbf16>
    %cst_10 = arith.constant dense<0.000000e+00> : vector<8x32xf32>
    %11 = tpu.matmul %9, %10, %cst_10 {dimension_numbers = #tpu.dot_dimension_numbers<[1], [0], [0], [1], [0, 0, 1, 1], [], []>} : vector<8x16xbf16>, vector<16x32xbf16>, vector<8x32xf32> -> vector<8x32xf32>
    %c0_11 = arith.constant 0 : index
    %c0_12 = arith.constant 0 : index
    %12 = vector.load %arg6[%c0_11, %c0_12] : memref<1x32xf32, #tpu.memory_space<vmem>>, vector<1x32xf32>
    %13 = vector.broadcast %12 : vector<1x32xf32> to vector<8x32xf32>
    %14 = arith.addf %11, %13 : vector<8x32xf32>
    %15 = vector.shape_cast %14 : vector<8x32xf32> to vector<8x1x32xf32>
    %16 = vector.broadcast %15 : vector<8x1x32xf32> to vector<8x8x32xf32>
    %17 = arith.addf %8, %16 : vector<8x8x32xf32>
    %18 = math.tanh %17 : vector<8x8x32xf32>
    %c0_13 = arith.constant 0 : index
    %c0_14 = arith.constant 0 : index
    %19 = vector.load %arg7[%c0_13, %c0_14] : memref<1x32xf32, #tpu.memory_space<vmem>>, vector<1x32xf32>
    %20 = vector.shape_cast %19 : vector<1x32xf32> to vector<1x1x32xf32>
    %21 = vector.broadcast %20 : vector<1x1x32xf32> to vector<8x8x32xf32>
    %22 = arith.mulf %18, %21 : vector<8x8x32xf32>
    %cst_15 = arith.constant dense<0.000000e+00> : vector<8x8xf32>
    %23 = vector.multi_reduction <add>, %22, %cst_15 [2] : vector<8x8x32xf32> to vector<8x8xf32>
    %c0_16 = arith.constant 0 : index
    %c0_17 = arith.constant 0 : index
    %24 = vector.load %arg8[%c0_16, %c0_17] : memref<1x1xf32, #tpu.memory_space<vmem>>, vector<1x1xf32>
    %25 = vector.broadcast %24 : vector<1x1xf32> to vector<8x8xf32>
    %26 = arith.addf %23, %25 : vector<8x8xf32>
    %cst_18 = arith.constant dense<0xFF800000> : vector<8xf32>
    %27 = vector.multi_reduction <maximumf>, %26, %cst_18 [1] : vector<8x8xf32> to vector<8xf32>
    %28 = vector.shape_cast %27 : vector<8xf32> to vector<8x1xf32>
    %29 = vector.broadcast %28 : vector<8x1xf32> to vector<8x8xf32>
    %30 = arith.subf %26, %29 : vector<8x8xf32>
    %31 = math.exp %30 : vector<8x8xf32>
    %cst_19 = arith.constant dense<0.000000e+00> : vector<8xf32>
    %32 = vector.multi_reduction <add>, %31, %cst_19 [1] : vector<8x8xf32> to vector<8xf32>
    %33 = vector.shape_cast %32 : vector<8xf32> to vector<8x1xf32>
    %34 = vector.broadcast %33 : vector<8x1xf32> to vector<8x8xf32>
    %35 = arith.divf %31, %34 : vector<8x8xf32>
    %36 = vector.shape_cast %35 : vector<8x8xf32> to vector<8x8x1xf32>
    %37 = arith.extf %0 : vector<8x8x32xbf16> to vector<8x8x32xf32>
    %38 = vector.broadcast %36 : vector<8x8x1xf32> to vector<8x8x32xf32>
    %39 = arith.mulf %38, %37 : vector<8x8x32xf32>
    %cst_20 = arith.constant dense<0.000000e+00> : vector<8x32xf32>
    %40 = vector.multi_reduction <add>, %39, %cst_20 [1] : vector<8x8x32xf32> to vector<8x32xf32>
    %c0_21 = arith.constant 0 : index
    %c0_22 = arith.constant 0 : index
    %41 = vector.load %arg9[%c0_21, %c0_22] : memref<8x32xf32, #tpu.memory_space<vmem>>, vector<8x32xf32>
    tpu.vector_store %arg9[%c0_21, %c0_22], %40 {strides = array<i32>} : memref<8x32xf32, #tpu.memory_space<vmem>>, vector<8x32xf32>,
    %c0_23 = arith.constant 0 : index
    %c0_24 = arith.constant 0 : index
    %42 = vector.load %arg10[%c0_23, %c0_24] : memref<8x8xf32, #tpu.memory_space<vmem>>, vector<8x8xf32>
    tpu.vector_store %arg10[%c0_23, %c0_24], %35 {strides = array<i32>} : memref<8x8xf32, #tpu.memory_space<vmem>>, vector<8x8xf32>,
    return
  }
  func.func @transform_0(%arg0: i32) -> (i32, i32, i32) {
    %c0_i32 = arith.constant 0 : i32
    %c0_i32_0 = arith.constant 0 : i32
    %c0_i32_1 = arith.constant 0 : i32
    return %arg0, %c0_i32, %c0_i32_0 : i32, i32, i32
  }
  func.func @transform_1(%arg0: i32) -> (i32, i32) {
    %c0_i32 = arith.constant 0 : i32
    %c0_i32_0 = arith.constant 0 : i32
    return %arg0, %c0_i32 : i32, i32
  }
  func.func @transform_2(%arg0: i32) -> (i32, i32) {
    %c0_i32 = arith.constant 0 : i32
    %c0_i32_0 = arith.constant 0 : i32
    %c0_i32_1 = arith.constant 0 : i32
    return %c0_i32, %c0_i32_0 : i32, i32
  }
  func.func @transform_3(%arg0: i32) -> (i32, i32) {
    %c0_i32 = arith.constant 0 : i32
    %c0_i32_0 = arith.constant 0 : i32
    %c0_i32_1 = arith.constant 0 : i32
    return %c0_i32, %c0_i32_0 : i32, i32
  }
  func.func @transform_4(%arg0: i32) -> (i32, i32) {
    %c0_i32 = arith.constant 0 : i32
    %c0_i32_0 = arith.constant 0 : i32
    %c0_i32_1 = arith.constant 0 : i32
    return %c0_i32, %c0_i32_0 : i32, i32
  }
  func.func @transform_5(%arg0: i32) -> (i32, i32) {
    %c0_i32 = arith.constant 0 : i32
    %c0_i32_0 = arith.constant 0 : i32
    %c0_i32_1 = arith.constant 0 : i32
    return %c0_i32, %c0_i32_0 : i32, i32
  }
  func.func @transform_6(%arg0: i32) -> (i32, i32) {
    %c0_i32 = arith.constant 0 : i32
    %c0_i32_0 = arith.constant 0 : i32
    %c0_i32_1 = arith.constant 0 : i32
    return %c0_i32, %c0_i32_0 : i32, i32
  }
  func.func @transform_7(%arg0: i32) -> (i32, i32) {
    %c0_i32 = arith.constant 0 : i32
    %c0_i32_0 = arith.constant 0 : i32
    %c0_i32_1 = arith.constant 0 : i32
    return %c0_i32, %c0_i32_0 : i32, i32
  }
  func.func @transform_8(%arg0: i32) -> (i32, i32) {
    %c0_i32 = arith.constant 0 : i32
    %c0_i32_0 = arith.constant 0 : i32
    return %arg0, %c0_i32 : i32, i32
  }
  func.func @transform_9(%arg0: i32) -> (i32, i32) {
    %c0_i32 = arith.constant 0 : i32
    %c0_i32_0 = arith.constant 0 : i32
    return %arg0, %c0_i32 : i32, i32
  }
}

</mosaic_0001>

<bundles_post_ra>
// kernel: tpu_custom_call.1
= control target key start
LH: loop header
LB: loop body
LE: loop exit
PB: predicated region body
PF: predicated region fallthrough
CT: control target
= control target key end

     0   :  { %s1368_s0 = inlined_call_operand.hbm [shape: bf16[8,8,32], index: 0, kind: input, shape index: {}]   ;;  %s1369_s1 = inlined_call_operand.hbm [shape: bf16[8,16], index: 1, kind: input, shape index: {}]   ;;  %s1370_s2 = inlined_call_operand.hbm [shape: bf16[32,32], index: 2, kind: input, shape index: {}]   ;;  %s1371_s3 = inlined_call_operand.vmem [shape: f32[1,32], index: 3, kind: input, shape index: {}]   ;;  %s1372_s4 = inlined_call_operand.hbm [shape: bf16[16,32], index: 4, kind: input, shape index: {}]   ;;  %s1373_s5 = inlined_call_operand.vmem [shape: f32[1,32], index: 5, kind: input, shape index: {}]   ;;  %s1374_s6 = inlined_call_operand.vmem [shape: f32[1,32], index: 6, kind: input, shape index: {}]   ;;  %s1375_s7 = inlined_call_operand.<no memory space> [shape: f32[1,1], index: 7, kind: input, shape index: {}]   ;;  %s1376_s8 = inlined_call_operand.hbm [shape: f32[8,32], index: 8, kind: output, shape index: {0}]   ;;  %s1377_s9 = inlined_call_operand.hbm [shape: f32[8,8], index: 9, kind: output, shape index: {1}]  }
   0x1   :  { %v15_v0 = vstv %s1375_s7 }
   0x2   :  { %16 = vst [vmem:[#allocation2] sm:$0x1] %v15_v0 }
   0x3   :  { %17 = vsyncpa [#allocation4], 0 }
   0x4   :  { %18 = vsyncpa [#allocation7], 0 }
   0x5   :  { %19 = vsyncpa [#allocation10], 0 }
   0x6   :  { %20 = vsyncpa [#allocation5], 0  ;;  %s40_s13 = sshll.u32 %s1369_s1, 4  ;;  %s41_s13 = int_to_ptr.hbm [resolvable:$true] %s40_s13 }
   0x7   :  { %21 = vsyncpa [#allocation13], 0  ;;  %s1025_s14 = smov [#allocation6]   ;;  %s26_s18 = sshll.u32 %s1368_s0, 4  ;;  %s27_s18 = int_to_ptr.hbm [resolvable:$true] %s26_s18 }
   0x8   :  { %s42_s15 = sshll.u32 %s1025_s14, 4  ;;  %s1026_s7 = smov [#allocation3]   ;;  %s43_s15 = int_to_ptr.vmem [resolvable:$true] %s42_s15 }
   0x9   :  { %45 = dma.hbm_to_vmem [thread:$0]  %s41_s13, 64, %s43_s15, [#allocation7]  }
   0xa   :  { %s28_s19 = sshll.u32 %s1026_s7, 4  ;;  %s1027_s20 = smov 64   ;;  %s29_s19 = int_to_ptr.vmem [resolvable:$true] %s28_s19 }
   0xb   :  { %s1028_s21 = smov 4   ;;  %s50_s1 = sshll.u32 %s1370_s2, 4  ;;  %s51_s1 = int_to_ptr.hbm [resolvable:$true] %s50_s1 }
   0xc   :  { %34 = dma.hbm_to_vmem [thread:$0]  %s27_s18, 512, %s29_s19, [#allocation4], %s1027_s20, %s1027_s20, %s1028_s21  }
   0xd   :  { %s1029_s24 = smov [#allocation8]   ;;  %s65_s0 = sshll.u32 %s1372_s4, 4  ;;  %s66_s0 = int_to_ptr.hbm [resolvable:$true] %s65_s0 }
   0xe   :  { %s52_s25 = sshll.u32 %s1029_s24, 4  ;;  %s1030_s28 = smov [#allocation9]   ;;  %s53_s25 = int_to_ptr.vmem [resolvable:$true] %s52_s25 }
   0xf   :  { %58 = dma.hbm_to_vmem [thread:$0]  %s51_s1, 256, %s53_s25, [#allocation7], %s1027_s20, %s1027_s20, %s1028_s21  }
  0x10   :  { %s67_s29 = sshll.u32 %s1030_s28, 4  ;;  %s68_s29 = int_to_ptr.vmem [resolvable:$true] %s67_s29 }
  0x11   :  { %73 = dma.hbm_to_vmem [thread:$0]  %s66_s0, 128, %s68_s29, [#allocation10], %s1027_s20, %s1027_s20, %s1028_s21  }
  0x12   :  { %1015 = dma.done.wait [#allocation4], 512  }
  0x13   :  { %1016 = vsyncadd [#allocation4], 4294966784 }
  0x14   :  { %1017 = dma.done.wait [#allocation7], 320  }
  0x15   :  { %1018 = vsyncadd [#allocation7], 4294966976 }
  0x16   :  { %1019 = dma.done.wait [#allocation10], 128  }
  0x17   :  { %1020 = vsyncadd [#allocation10], 4294967168  ;;  %v801_v1 = vld [vmem:[#allocation8 + $0x8] sm:$0xff]  ;;  %v802_v2 = vld [vmem:[#allocation9] sm:$0xff]  ;;  %vm208_vm0 = vcmask 130048   ;;  %vm141_vm1 = vcmask 261120  }
  0x18   :  { %160 = vmatpush.bf16.msra.mxu0 %v801_v1  ;;  %803 = vmatpush.bf16.msra.mxu2 %v801_v1  ;;  %v800_v3 = vld [vmem:[#allocation8] sm:$0xff]  ;;  %v195_v4 = vld [vmem:[#allocation6] sm:$0xf]  ;;  %v799_v7 = vld [vmem:[#allocation3 + $0x18] sm:$0xff]  ;;  %v1031_v23 = vmov 0   ;;  %vm334_vm2 = vcmask 1041409  }
  0x19   :  { %804 = vmatpush.bf16.msra.mxu3 %v801_v1  ;;  %219 = vmatpush.bf16.msra.mxu1 %v802_v2  ;;  %v796_v5 = vld [vmem:[#allocation3] sm:$0xff]  ;;  %v797_v6 = vld [vmem:[#allocation3 + $0x8] sm:$0xff]  ;;  %v798_v8 = vld [vmem:[#allocation3 + $0x10] sm:$0xff]  ;;  %vm336_vm3 = vcmask 1042434   ;;  %vm338_vm4 = vcmask 1043459   ;;  %vm340_vm5 = vcmask 1044484  }
  0x1a   :  { %v819_v9 = vld [vmem:[%s1373_s5] ss:$0 sm:$0xff]  ;;  %816 = vset.pattern.permute.xlu1 %v1031_v23  ;;  %818 = vset.pattern.permute.xlu2 %v1031_v23  ;;  %vm342_vm6 = vcmask 1045509   ;;  %vm1380_vm7 = vcmask 1046534   ;;  %vm1379_vm8 = vcmask 1047559   ;;  %vm1378_vm9 = vcmask 64512  }
  0x1b   :  { %v1109_v11 = vld [vmem:[%s1371_s3] ss:$0 sm:$0xff]  ;;  %817 = vset.pattern.permute.xlu0 %v1031_v23  ;;  %s746_s14 = sshll.u32 %s1377_s9, 4  ;;  %s1033_s9 = smov [#allocation11]   ;;  %s747_s14 = int_to_ptr.hbm [resolvable:$true] %s746_s14 }
  0x1c   :  { %795 = vmatmul.msk.bf16.vlgmr.msra.gmra.mxu1 %vm208_vm0, %v195_v4  ;;  %161 = vmatpush.bf16.msra.mxu0 %v800_v3  ;;  %v1121_v26 = vld [vmem:[%s1374_s6] ss:$0 sm:$0xff]  ;;  %s1032_s6 = smov [#allocation12]   ;;  %s733_s15 = sshll.u32 %s1033_s9, 4  ;;  %s734_s15 = int_to_ptr.vmem [resolvable:$true] %s733_s15 }
  0x1d   :  { %805 = vmatpush.bf16.msra.mxu2 %v800_v3  ;;  %806 = vmatpush.bf16.msra.mxu3 %v800_v3  ;;  %s744_s11 = sshll.u32 %s1032_s6, 4  ;;  %s735_s18 = sshll.u32 %s1376_s8, 4  ;;  %s745_s11 = int_to_ptr.vmem [resolvable:$true] %s744_s11  ;;  %s736_s18 = int_to_ptr.hbm [resolvable:$true] %s735_s18 }
  0x1f   :  { %787 = vmatmul.msk.bf16.vlgmr.msra.gmra.mxu0 %vm141_vm1, %v796_v5 }
  0x20   :  { %788 = vmatmul.msk.bf16.vlgmr.msra.gmra.mxu2 %vm141_vm1, %v797_v6  ;;  %790 = vmatmul.msk.bf16.vlgmr.msra.gmra.mxu3 %vm141_vm1, %v799_v7 }
  0x30   :  { %789 = vmatmul.msk.bf16.gmra.mxu2 %vm141_vm1, %v798_v8 }
  0x99   :  { %v221_v10 = vpop.f32.mrf.mxu1 }
  0x9a   :  { %v1111_v12 = vadd.f32 %v819_v9, %v221_v10  ;;  %v822_v10 = vld [vmem:[#allocation2] ss:$0 sm:$0xff] }
  0x9c   :  { %v163_v13 = vpop.f32.mrf.mxu0  ;;  %v233_v14 = vperm.slane %v1111_v12, 0  ;;  %v227_v16 = vrot.slane %v1111_v12, 2  ;;  %v226_v18 = vrot.slane %v1111_v12, 1  ;;  %v228_v31 = vrot.slane %v1111_v12, 3 }
  0x9d   :  { %v187_v15 = vadd.f32 %v1109_v11, %v163_v13  ;;  %v231_v42 = vrot.slane %v1111_v12, 6  ;;  %v229_v43 = vrot.slane %v1111_v12, 4  ;;  %v230_v56 = vrot.slane %v1111_v12, 5 }
  0x9e   :  { %v235_v20 = vperm.slane %v227_v16, 0  ;;  %v234_v22 = vperm.slane %v226_v18, 0  ;;  %v236_v36 = vperm.slane %v228_v31, 0  ;;  %v232_v59 = vrot.slane %v1111_v12, 7 }
  0x9f   :  { %v249_v17 = vadd.f32 %v233_v14, %v187_v15  ;;  %v239_v49 = vperm.slane %v231_v42, 0  ;;  %v237_v51 = vperm.slane %v229_v43, 0  ;;  %v238_v63 = vperm.slane %v230_v56, 0 }
  0xa0   :  { %v240_v1 = vperm.slane %v232_v59, 0 }
  0xa1   :  { %823 = vtanh.f32 %v249_v17  ;;  %v223_v19 = vpop.f32.mrf.mxu1 }
  0xa3   :  { %v168_v21 = vpop.f32.mrf.mxu2  ;;  %v178_v39 = vpop.f32.mrf.mxu3 }
  0xa4   :  { %v189_v24 = vadd.f32 %v1109_v11, %v168_v21  ;;  %v165_v25 = vpop.f32.mrf.mxu0  ;;  %v193_v48 = vadd.f32 %v1109_v11, %v178_v39  ;;  %v324_v21 = vlaneseq }
  0xa5   :  { %v188_v27 = vadd.f32 %v1109_v11, %v165_v25 }
  0xa6   :  { %v251_v28 = vadd.f32 %v235_v20, %v189_v24  ;;  %v255_v55 = vadd.f32 %v239_v49, %v193_v48 }
  0xa7   :  { %v824_v29 = vpop.eup %823  ;;  %v250_v30 = vadd.f32 %v234_v22, %v188_v27  ;;  %v1150_v22 = vand.u32 127, %v324_v21 }
  0xa8   :  { %825 = vtanh.f32 %v251_v28  ;;  %v269_v32 = vmul.f32 %v824_v29, %v1121_v26 }
  0xa9   :  { %827 = vtanh.f32 %v250_v30 }
  0xaa   :  { %v277_v33 = vsel %vm141_vm1, %v269_v32, 0.0 }
  0xab   :  { %v170_v34 = vpop.f32.mrf.mxu2  ;;  %278 = vadd.xlane.f32.xlu0 %v277_v33  ;;  %v180_v57 = vpop.f32.mrf.mxu3 }
  0xac   :  { %v190_v35 = vadd.f32 %v1109_v11, %v170_v34  ;;  %v194_v61 = vadd.f32 %v1109_v11, %v180_v57 }
  0xae   :  { %v826_v37 = vpop.eup %825  ;;  %v252_v38 = vadd.f32 %v236_v36, %v190_v35  ;;  %v256_v4 = vadd.f32 %v240_v1, %v194_v61 }
  0xaf   :  { %v271_v40 = vmul.f32 %v826_v37, %v1121_v26  ;;  %v828_v41 = vpop.eup %827 }
  0xb0   :  { %829 = vtanh.f32 %v252_v38  ;;  %v270_v45 = vmul.f32 %v828_v41, %v1121_v26 }
  0xb1   :  { %v283_v44 = vsel %vm141_vm1, %v271_v40, 0.0 }
  0xb2   :  { %284 = vadd.xlane.f32.xlu1 %v283_v44  ;;  %v280_v47 = vsel %vm141_vm1, %v270_v45, 0.0 }
  0xb3   :  { %v173_v46 = vpop.f32.mrf.mxu2  ;;  %281 = vadd.xlane.f32.xlu0 %v280_v47 }
  0xb4   :  { %v191_v50 = vadd.f32 %v1109_v11, %v173_v46 }
  0xb6   :  { %v830_v52 = vpop.eup %829  ;;  %v253_v53 = vadd.f32 %v237_v51, %v191_v50 }
  0xb7   :  { %v272_v54 = vmul.f32 %v830_v52, %v1121_v26 }
  0xb8   :  { %831 = vtanh.f32 %v253_v53 }
  0xb9   :  { %v286_v58 = vsel %vm141_vm1, %v272_v54, 0.0  ;;  %833 = vtanh.f32 %v255_v55 }
  0xba   :  { %287 = vadd.xlane.f32.xlu2 %v286_v58 }
  0xbb   :  { %v175_v60 = vpop.f32.mrf.mxu2 }
  0xbc   :  { %v192_v62 = vadd.f32 %v1109_v11, %v175_v60 }
  0xbe   :  { %v832_v0 = vpop.eup %831  ;;  %v254_v2 = vadd.f32 %v238_v63, %v192_v62 }
  0xbf   :  { %v273_v3 = vmul.f32 %v832_v0, %v1121_v26  ;;  %v834_v6 = vpop.eup %833 }
  0xc0   :  { %835 = vtanh.f32 %v254_v2  ;;  %v275_v7 = vmul.f32 %v834_v6, %v1121_v26 }
  0xc1   :  { %v289_v5 = vsel %vm141_vm1, %v273_v3, 0.0  ;;  %837 = vtanh.f32 %v256_v4 }
  0xc2   :  { %290 = vadd.xlane.f32.xlu2 %v289_v5  ;;  %v295_v11 = vsel %vm141_vm1, %v275_v7, 0.0 }
  0xc6   :  { %v836_v8 = vpop.eup %835 }
  0xc7   :  { %v274_v9 = vmul.f32 %v836_v8, %v1121_v26  ;;  %v838_v13 = vpop.eup %837 }
  0xc8   :  { %v276_v14 = vmul.f32 %v838_v13, %v1121_v26 }
  0xc9   :  { %v292_v12 = vsel %vm141_vm1, %v274_v9, 0.0 }
  0xca   :  { %296 = vadd.xlane.f32.xlu2 %v295_v11  ;;  %293 = vadd.xlane.f32.xlu0 %v292_v12  ;;  %v298_v15 = vsel %vm141_vm1, %v276_v14, 0.0 }
  0xcb   :  { %305 = vperm.xlu1 %816, %v822_v10  }
  0xd2   :  { %299 = vadd.xlane.f32.xlu0 %v298_v15 }
 0x11e   :  { %v279_v16 = vpop.xlane.xlu0 %278 }
 0x125   :  { %v285_v18 = vpop.xlane.xlu1 %284 }
 0x126   :  { %v282_v19 = vpop.xlane.xlu0 %281 }
 0x12d   :  { %v288_v17 = vpop.xlane.xlu2 %287 }
 0x135   :  { %v291_v20 = vpop.xlane.xlu2 %290 }
 0x13d   :  { %v306_v23 = vpop.permute.xlu1 %305  ;;  %v294_v27 = vpop.xlane.xlu0 %293 }
 0x13e   :  { %v308_v24 = vadd.f32 %v306_v23, %v279_v16  ;;  %v309_v25 = vadd.f32 %v306_v23, %v282_v19  ;;  %v310_v28 = vadd.f32 %v306_v23, %v285_v18  ;;  %v311_v29 = vadd.f32 %v306_v23, %v288_v17  ;;  %v297_v33 = vpop.xlane.xlu2 %296 }
 0x13f   :  { %v312_v30 = vadd.f32 %v306_v23, %v291_v20  ;;  %v313_v34 = vadd.f32 %v306_v23, %v294_v27  ;;  %v314_v39 = vadd.f32 %v306_v23, %v297_v33 }
 0x140   :  { %v326_v26 = vperm.slane %v308_v24, %v1150_v22  ;;  %v327_v31 = vperm.slane %v309_v25, %v1150_v22  ;;  %v328_v32 = vperm.slane %v310_v28, %v1150_v22  ;;  %v329_v35 = vperm.slane %v311_v29, %v1150_v22 }
 0x141   :  { %v330_v37 = vperm.slane %v312_v30, %v1150_v22  ;;  %v331_v41 = vperm.slane %v313_v34, %v1150_v22  ;;  %v332_v46 = vperm.slane %v314_v39, %v1150_v22 }
 0x142   :  { %v335_v36 = vsel %vm334_vm2, %v327_v31, %v326_v26 }
 0x143   :  { %v337_v38 = vsel %vm336_vm3, %v328_v32, %v335_v36 }
 0x144   :  { %v339_v40 = vsel %vm338_vm4, %v329_v35, %v337_v38 }
 0x145   :  { %v341_v42 = vsel %vm340_vm5, %v330_v37, %v339_v40  ;;  %v300_v43 = vpop.xlane.xlu0 %299 }
 0x146   :  { %v315_v44 = vadd.f32 %v306_v23, %v300_v43  ;;  %v343_v45 = vsel %vm342_vm6, %v331_v41, %v341_v42 }
 0x147   :  { %v345_v48 = vsel %vm1380_vm7, %v332_v46, %v343_v45 }
 0x148   :  { %v333_v47 = vperm.slane %v315_v44, %v1150_v22 }
 0x14a   :  { %v347_v49 = vsel %vm1379_vm8, %v333_v47, %v345_v48 }
 0x14b   :  { %v350_v50 = vsel %vm1378_vm9, %v347_v49, -inf }
 0x14c   :  { %351 = vmax.xlane.f32.xlu2 %v350_v50 }
 0x1bf   :  { %v352_v51 = vpop.xlane.xlu2 %351 }
 0x1c0   :  { %v356_v52 = vperm.slane %v352_v51, 2  ;;  %v355_v53 = vperm.slane %v352_v51, 1  ;;  %v354_v54 = vperm.slane %v352_v51, 0  ;;  %v357_v58 = vperm.slane %v352_v51, 3 }
 0x1c1   :  { %v359_v59 = vperm.slane %v352_v51, 5  ;;  %v358_v2 = vperm.slane %v352_v51, 4  ;;  %v361_v4 = vperm.slane %v352_v51, 7  ;;  %v360_v11 = vperm.slane %v352_v51, 6 }
 0x1c2   :  { %v372_v55 = vsub.f32 %v310_v28, %v356_v52  ;;  %v371_v56 = vsub.f32 %v309_v25, %v355_v53  ;;  %v370_v57 = vsub.f32 %v308_v24, %v354_v54  ;;  %v373_v63 = vsub.f32 %v311_v29, %v357_v58 }
 0x1c3   :  { %v375_v0 = vsub.f32 %v313_v34, %v359_v59  ;;  %v374_v8 = vsub.f32 %v312_v30, %v358_v2  ;;  %v377_v9 = vsub.f32 %v315_v44, %v361_v4  ;;  %v376_v15 = vsub.f32 %v314_v39, %v360_v11 }
 0x1c4   :  { %v382_v60 = vmul.f32 1.442695, %v372_v55  ;;  %v380_v61 = vmul.f32 1.442695, %v371_v56  ;;  %v378_v62 = vmul.f32 1.442695, %v370_v57 }
 0x1c5   :  { %v384_v1 = vmul.f32 1.442695, %v373_v63  ;;  %v388_v3 = vmul.f32 1.442695, %v375_v0  ;;  %v386_v10 = vmul.f32 1.442695, %v374_v8 }
 0x1c6   :  { %839 = vpow2.f32 %v382_v60  ;;  %v392_v12 = vmul.f32 1.442695, %v377_v9  ;;  %v390_v16 = vmul.f32 1.442695, %v376_v15 }
 0x1c7   :  { %841 = vpow2.f32 %v380_v61 }
 0x1c8   :  { %843 = vpow2.f32 %v378_v62 }
 0x1c9   :  { %845 = vpow2.f32 %v384_v1 }
 0x1ca   :  { %847 = vpow2.f32 %v388_v3 }
 0x1cb   :  { %849 = vpow2.f32 %v386_v10 }
 0x1cc   :  { %v1168_v5 = vpop.eup %839  ;;  %851 = vpow2.f32 %v392_v12 }
 0x1cd   :  { %v1170_v6 = vpop.eup %841  ;;  %409 = vperm.xlu1 %816, %v1168_v5   ;;  %853 = vpow2.f32 %v390_v16 }
 0x1ce   :  { %v1173_v7 = vpop.eup %843  ;;  %406 = vperm.xlu2 %818, %v1170_v6  }
 0x1cf   :  { %403 = vperm.xlu0 %817, %v1173_v7   ;;  %v1177_v13 = vpop.eup %845 }
 0x1d0   :  { %v1179_v14 = vpop.eup %847 }
 0x1d1   :  { %v1183_v17 = vpop.eup %849 }
 0x1d2   :  { %v1185_v18 = vpop.eup %851 }
 0x1d3   :  { %v1189_v19 = vpop.eup %853 }
 0x1d5   :  { %412 = vperm.xlu1 %816, %v1177_v13  }
 0x1d6   :  { %418 = vperm.xlu2 %818, %v1179_v14  }
 0x1dd   :  { %415 = vperm.xlu1 %816, %v1183_v17  }
 0x1de   :  { %424 = vperm.xlu2 %818, %v1185_v18  }
 0x1e5   :  { %421 = vperm.xlu1 %816, %v1189_v19  }
 0x228   :  { %v407_v21 = vpop.permute.xlu2 %406 }
 0x229   :  { %v427_v28 = vperm.slane %v407_v21, %v1150_v22 }
 0x230   :  { %v419_v25 = vpop.permute.xlu2 %418 }
 0x231   :  { %v431_v37 = vperm.slane %v419_v25, %v1150_v22 }
 0x238   :  { %v425_v35 = vpop.permute.xlu2 %424 }
 0x239   :  { %v433_v40 = vperm.slane %v425_v35, %v1150_v22 }
 0x23f   :  { %v410_v20 = vpop.permute.xlu1 %409 }
 0x240   :  { %v428_v30 = vperm.slane %v410_v20, %v1150_v22 }
 0x241   :  { %v404_v24 = vpop.permute.xlu0 %403 }
 0x242   :  { %v426_v27 = vperm.slane %v404_v24, %v1150_v22 }
 0x244   :  { %v434_v26 = vsel %vm334_vm2, %v427_v28, %v426_v27 }
 0x245   :  { %v435_v33 = vsel %vm336_vm3, %v428_v30, %v434_v26 }
 0x247   :  { %v413_v23 = vpop.permute.xlu1 %412 }
 0x248   :  { %v429_v31 = vperm.slane %v413_v23, %v1150_v22 }
 0x24a   :  { %v436_v34 = vsel %vm338_vm4, %v429_v31, %v435_v33 }
 0x24f   :  { %v416_v29 = vpop.permute.xlu1 %415 }
 0x250   :  { %v430_v32 = vperm.slane %v416_v29, %v1150_v22 }
 0x252   :  { %v437_v36 = vsel %vm340_vm5, %v430_v32, %v436_v34 }
 0x253   :  { %v438_v41 = vsel %vm342_vm6, %v431_v37, %v437_v36 }
 0x257   :  { %v422_v38 = vpop.permute.xlu1 %421 }
 0x258   :  { %v432_v39 = vperm.slane %v422_v38, %v1150_v22 }
 0x25a   :  { %v439_v42 = vsel %vm1380_vm7, %v432_v39, %v438_v41 }
 0x25b   :  { %v440_v43 = vsel %vm1379_vm8, %v433_v40, %v439_v42 }
 0x25c   :  { %v442_v44 = vsel %vm1378_vm9, %v440_v43, 0.0 }
 0x25d   :  { %443 = vadd.xlane.f32.xlu1 %v442_v44 }
 0x2d0   :  { %v444_v45 = vpop.xlane.xlu1 %443 }
 0x2d1   :  { %v446_v46 = vperm.slane %v444_v45, 0  ;;  %v447_v47 = vperm.slane %v444_v45, 1  ;;  %v1208_v48 = vperm.slane %v444_v45, 2  ;;  %v1210_v49 = vperm.slane %v444_v45, 3 }
 0x2d2   :  { %v1212_v50 = vperm.slane %v444_v45, 4  ;;  %v1214_v51 = vperm.slane %v444_v45, 5  ;;  %v1220_v56 = vperm.slane %v444_v45, 7  ;;  %v1222_v59 = vperm.slane %v444_v45, 6 }
 0x2d3   :  { %855 = vrcp.f32 %v446_v46  ;;  %v486_v52 = vand.u32 2147483647, %v447_v47  ;;  %v488_v53 = vand.u32 2147483648, %v447_v47  ;;  %v471_v54 = vand.u32 2147483647, %v446_v46 }
 0x2d4   :  { %857 = vrcp.f32 %v447_v47  ;;  %v473_v57 = vand.u32 2147483648, %v446_v46  ;;  %vm482_vm10 = vweird.f32 %v447_v47  ;;  %vm467_vm12 = vweird.f32 %v446_v46 }
 0x2d5   :  { %859 = vrcp.f32 %v1208_v48  ;;  %vm1226_vm11 = vcmp.eq.f32.partialorder %v486_v52, 8.507059e+37  ;;  %v489_v1 = vor.u32 1.1754944e-38, %v488_v53  ;;  %vm1232_vm13 = vcmp.eq.f32.partialorder %v471_v54, 8.507059e+37 }
 0x2d6   :  { %861 = vrcp.f32 %v1210_v49  ;;  %v474_v10 = vor.u32 1.1754944e-38, %v473_v57  ;;  %v518_v27 = vand.u32 2147483648, %v1210_v49  ;;  %v503_v29 = vand.u32 2147483648, %v1208_v48 }
 0x2d7   :  { %863 = vrcp.f32 %v1212_v50  ;;  %v501_v41 = vand.u32 2147483647, %v1208_v48  ;;  %v516_v43 = vand.u32 2147483647, %v1210_v49  ;;  %v548_v53 = vand.u32 2147483648, %v1214_v51 }
 0x2d8   :  { %865 = vrcp.f32 %v1214_v51  ;;  %v531_v63 = vand.u32 2147483647, %v1212_v50 }
 0x2d9   :  { %v856_v55 = vpop.eup %855  ;;  %867 = vrcp.f32 %v1220_v56 }
 0x2da   :  { %v858_v58 = vpop.eup %857  ;;  %v463_v60 = vmul.f32 %v856_v55, %v446_v46  ;;  %vm468_vm14 = vweird.f32 %v856_v55  ;;  %869 = vrcp.f32 %v1222_v59  ;;  %v504_v46 = vor.u32 1.1754944e-38, %v503_v29 }
 0x2db   :  { %v1224_v61 = vpop.eup %859  ;;  %v478_v62 = vmul.f32 %v858_v58, %v447_v47  ;;  %vm483_vm15 = vweird.f32 %v858_v58  ;;  %vm469_vm0 = vmor %vm467_vm12, %vm468_vm14  ;;  %vm512_vm12 = vweird.f32 %v1210_v49 }
 0x2dc   :  { %v1230_v0 = vpop.eup %861  ;;  %v464_v2 = vsub.f32 1.0, %v463_v60  ;;  %v493_v4 = vmul.f32 %v1224_v61, %v1208_v48  ;;  %vm498_vm9 = vweird.f32 %v1224_v61  ;;  %vm484_vm8 = vmor %vm482_vm10, %vm483_vm15  ;;  %vm497_vm10 = vweird.f32 %v1208_v48 }
 0x2dd   :  { %v1238_v8 = vpop.eup %863  ;;  %v479_v9 = vsub.f32 1.0, %v478_v62  ;;  %v508_v11 = vmul.f32 %v1230_v0, %v1210_v49  ;;  %vm513_vm7 = vweird.f32 %v1230_v0  ;;  %v519_v49 = vor.u32 1.1754944e-38, %v518_v27 }
 0x2de   :  { %v1243_v12 = vpop.eup %865  ;;  %v465_v15 = vmul.f32 %v856_v55, %v464_v2  ;;  %v494_v16 = vsub.f32 1.0, %v493_v4  ;;  %v523_v20 = vmul.f32 %v1238_v8, %v1212_v50  ;;  %v533_v60 = vand.u32 2147483648, %v1212_v50 }
 0x2df   :  { %v480_v21 = vmul.f32 %v858_v58, %v479_v9  ;;  %v509_v23 = vsub.f32 1.0, %v508_v11  ;;  %v538_v24 = vmul.f32 %v1243_v12, %v1214_v51  ;;  %v1259_v34 = vpop.eup %867  ;;  %vm543_vm14 = vweird.f32 %v1243_v12 }
 0x2e0   :  { %v466_v25 = vadd.f32 %v856_v55, %v465_v15  ;;  %v495_v28 = vmul.f32 %v1224_v61, %v494_v16  ;;  %v524_v33 = vsub.f32 1.0, %v523_v20  ;;  %v1278_v45 = vpop.eup %869  ;;  %v568_v48 = vmul.f32 %v1259_v34, %v1220_v56 }
 0x2e1   :  { %v481_v30 = vadd.f32 %v858_v58, %v480_v21  ;;  %v510_v26 = vmul.f32 %v1230_v0, %v509_v23  ;;  %v539_v38 = vsub.f32 1.0, %v538_v24  ;;  %v553_v57 = vmul.f32 %v1278_v45, %v1222_v59 }
 0x2e2   :  { %v470_v31 = vsel %vm469_vm0, %v856_v55, %v466_v25  ;;  %v496_v32 = vadd.f32 %v1224_v61, %v495_v28  ;;  %vm527_vm15 = vweird.f32 %v1212_v50  ;;  %vm542_vm0 = vweird.f32 %v1214_v51 }
 0x2e3   :  { %v485_v35 = vsel %vm484_vm8, %v858_v58, %v481_v30  ;;  %v475_v36 = vsel %vm1232_vm13, %v474_v10, %v470_v31  ;;  %v511_v37 = vadd.f32 %v1230_v0, %v510_v26  ;;  %vm499_vm8 = vmor %vm497_vm10, %vm498_vm9  ;;  %v540_v47 = vmul.f32 %v1243_v12, %v539_v38  ;;  %v98_v26 = vld [vmem:[#allocation3 + $0x4] sm:$0xff]   ;;  %v97_v31 = vld [vmem:[#allocation3] sm:$0xf] }
 0x2e4   :  { %v490_v39 = vsel %vm1226_vm11, %v489_v1, %v485_v35  ;;  %v476_v40 = vmul.f32 %v1173_v7, %v475_v36  ;;  %vm514_vm13 = vmor %vm512_vm12, %vm513_vm7  ;;  %v500_v44 = vsel %vm499_vm8, %v1224_v61, %v496_v32  ;;  %v525_v7 = vmul.f32 %v1238_v8, %v524_v33 }
 0x2e5   :  { %v491_v42 = vmul.f32 %v1170_v6, %v490_v39  ;;  %v515_v6 = vsel %vm514_vm13, %v1230_v0, %v511_v37  ;;  %vm502_vm9 = vcmp.eq.f32.partialorder %v501_v41, 8.507059e+37  ;;  %vm517_vm11 = vcmp.eq.f32.partialorder %v516_v43, 8.507059e+37  ;;  %vm544_vm12 = vmor %vm542_vm0, %vm543_vm14 }
 0x2e6   :  { %592 = vperm.xlu0 %817, %v476_v40   ;;  %v505_v52 = vsel %vm502_vm9, %v504_v46, %v500_v44  ;;  %v520_v54 = vsel %vm517_vm11, %v519_v49, %v515_v6  ;;  %v526_v55 = vadd.f32 %v1238_v8, %v525_v7  ;;  %vm528_vm7 = vweird.f32 %v1238_v8  ;;  %v1320_v40 = vld [vmem:[#allocation3 + $0x14] sm:$0xff]  }
 0x2e7   :  { %597 = vperm.xlu2 %818, %v491_v42   ;;  %v541_v58 = vadd.f32 %v1243_v12, %v540_v47  ;;  %v569_v61 = vsub.f32 1.0, %v568_v48  ;;  %v506_v62 = vmul.f32 %v1168_v5, %v505_v52  ;;  %v554_v0 = vsub.f32 1.0, %v553_v57  ;;  %vm529_vm10 = vmor %vm527_vm15, %vm528_vm7 }
 0x2e8   :  { %v521_v1 = vmul.f32 %v1177_v13, %v520_v54  ;;  %v546_v2 = vand.u32 2147483647, %v1214_v51  ;;  %v530_v3 = vsel %vm529_vm10, %v1238_v8, %v526_v55  ;;  %v534_v9 = vor.u32 1.1754944e-38, %v533_v60 }
 0x2e9   :  { %v555_v4 = vmul.f32 %v1278_v45, %v554_v0  ;;  %v545_v5 = vsel %vm544_vm12, %v1243_v12, %v541_v58  ;;  %v570_v50 = vmul.f32 %v1259_v34, %v569_v61  ;;  %v549_v10 = vor.u32 1.1754944e-38, %v548_v53 }
 0x2ea   :  { %vm532_vm8 = vcmp.eq.f32.partialorder %v531_v63, 8.507059e+37  ;;  %vm547_vm13 = vcmp.eq.f32.partialorder %v546_v2, 8.507059e+37  ;;  %vm558_vm9 = vweird.f32 %v1278_v45  ;;  %vm573_vm11 = vweird.f32 %v1259_v34 }
 0x2eb   :  { %v535_v13 = vsel %vm532_vm8, %v534_v9, %v530_v3  ;;  %v550_v11 = vsel %vm547_vm13, %v549_v10, %v545_v5  ;;  %v556_v51 = vadd.f32 %v1278_v45, %v555_v4  ;;  %v571_v15 = vadd.f32 %v1259_v34, %v570_v50 }
 0x2ec   :  { %v563_v8 = vand.u32 2147483648, %v1222_v59  ;;  %v536_v12 = vmul.f32 %v1183_v17, %v535_v13  ;;  %v578_v16 = vand.u32 2147483648, %v1220_v56  ;;  %vm557_vm7 = vweird.f32 %v1222_v59 }
 0x2ed   :  { %v561_v20 = vand.u32 2147483647, %v1222_v59  ;;  %v551_v21 = vmul.f32 %v1179_v14, %v550_v11  ;;  %vm572_vm14 = vweird.f32 %v1220_v56  ;;  %v576_v23 = vand.u32 2147483647, %v1220_v56  ;;  %vm559_vm15 = vmor %vm557_vm7, %vm558_vm9 }
 0x2ee   :  { %602 = vperm.xlu0 %817, %v506_v62   ;;  %vm574_vm0 = vmor %vm572_vm14, %vm573_vm11  ;;  %v560_v24 = vsel %vm559_vm15, %v1278_v45, %v556_v51  ;;  %v564_v25 = vor.u32 1.1754944e-38, %v563_v8  ;;  %v579_v27 = vor.u32 1.1754944e-38, %v578_v16  ;;  %v583_v32 = vunpack.c.l.bf16 %v98_v26 }
 0x2ef   :  { %607 = vperm.xlu2 %818, %v521_v1   ;;  %v575_v17 = vsel %vm574_vm0, %v1259_v34, %v571_v15  ;;  %vm562_vm10 = vcmp.eq.f32.partialorder %v561_v20, 8.507059e+37  ;;  %vm577_vm12 = vcmp.eq.f32.partialorder %v576_v23, 8.507059e+37  ;;  %v582_v33 = vunpack.c.l.bf16 %v97_v31  ;;  %v100_v34 = vld [vmem:[#allocation3 + $0xc] sm:$0xff]  }
 0x2f0   :  { %v565_v28 = vsel %vm562_vm10, %v564_v25, %v560_v24  ;;  %v580_v59 = vsel %vm577_vm12, %v579_v27, %v575_v17  ;;  %v585_v39 = vunpack.c.l.bf16 %v100_v34  ;;  %v584_v42 = vunpack.c.h.bf16 %v98_v26 }
 0x2f1   :  { %v566_v14 = vmul.f32 %v1189_v19, %v565_v28  ;;  %v581_v29 = vmul.f32 %v1185_v18, %v580_v59  ;;  %v104_v19 = vld [vmem:[#allocation3 + $0x1c] sm:$0xf]  ;;  %v587_v44 = vunpack.c.l.bf16 %v1320_v40  ;;  %v586_v61 = vunpack.c.h.bf16 %v100_v34 }
 0x2f2   :  { %v589_v7 = vunpack.c.l.bf16 %v104_v19  ;;  %v588_v28 = vunpack.c.h.bf16 %v1320_v40  ;;  %vm1385_vm8 = vcmask 1046534   ;;  %vm1386_vm13 = vcmask 1047559  }
 0x2f3   :  { %vm1387_vm9 = vcmask 64512  }
 0x2f6   :  { %612 = vperm.xlu0 %817, %v536_v12  }
 0x2f7   :  { %617 = vperm.xlu2 %818, %v551_v21  }
 0x2fe   :  { %622 = vperm.xlu0 %817, %v566_v14  }
 0x2ff   :  { %627 = vperm.xlu2 %818, %v581_v29  }
 0x341   :  { %v598_v56 = vpop.permute.xlu2 %597 }
 0x342   :  { %v631_v37 = vmul.f32 %v598_v56, %v583_v32  ;;  %v712_v5 = vperm.slane %v598_v56, %v1150_v22 }
 0x344   :  { %v645_v41 = vsel %vm141_vm1, %v631_v37, 0.0 }
 0x345   :  { %v646_v6 = vrot.slane %v645_v41, 4 }
 0x347   :  { %v647_v57 = vadd.f32 %v646_v6, %v645_v41 }
 0x349   :  { %v608_v30 = vpop.permute.xlu2 %607  ;;  %v648_v4 = vrot.slane %v647_v57, 2 }
 0x34a   :  { %v633_v43 = vmul.f32 %v608_v30, %v585_v39  ;;  %v714_v23 = vperm.slane %v608_v30, %v1150_v22 }
 0x34b   :  { %v649_v21 = vadd.f32 %v648_v4, %v647_v57 }
 0x34c   :  { %v659_v49 = vsel %vm141_vm1, %v633_v43, 0.0 }
 0x34d   :  { %v660_v60 = vrot.slane %v659_v49, 4  ;;  %v650_v31 = vrot.slane %v649_v21, 1 }
 0x34f   :  { %v661_v10 = vadd.f32 %v660_v60, %v659_v49 }
 0x351   :  { %v1318_v35 = vpop.permute.xlu2 %617  ;;  %v662_v25 = vrot.slane %v661_v10, 2 }
 0x352   :  { %v635_v52 = vmul.f32 %v1318_v35, %v587_v44  ;;  %v716_v32 = vperm.slane %v1318_v35, %v1150_v22 }
 0x354   :  { %v673_v62 = vsel %vm141_vm1, %v635_v52, 0.0 }
 0x355   :  { %v674_v13 = vrot.slane %v673_v62, 4 }
 0x357   :  { %v675_v27 = vadd.f32 %v674_v13, %v673_v62 }
 0x358   :  { %v593_v36 = vpop.permute.xlu0 %592 }
 0x359   :  { %v630_v38 = vmul.f32 %v593_v36, %v582_v33  ;;  %v1325_v46 = vpop.permute.xlu2 %627  ;;  %v711_v63 = vperm.slane %v593_v36, %v1150_v22  ;;  %v663_v36 = vadd.f32 %v662_v25, %v661_v10  ;;  %v676_v37 = vrot.slane %v675_v27, 2 }
 0x35a   :  { %v637_v53 = vmul.f32 %v1325_v46, %v589_v7  ;;  %v718_v40 = vperm.slane %v1325_v46, %v1150_v22 }
 0x35b   :  { %v638_v18 = vsel %vm141_vm1, %v630_v38, 0.0  ;;  %v719_v15 = vsel %vm334_vm2, %v712_v5, %v711_v63  ;;  %v677_v49 = vadd.f32 %v676_v37, %v675_v27 }
 0x35c   :  { %v639_v45 = vrot.slane %v638_v18, 4  ;;  %v687_v1 = vsel %vm141_vm1, %v637_v53, 0.0 }
 0x35d   :  { %v688_v51 = vrot.slane %v687_v1, 4 }
 0x35e   :  { %v640_v54 = vadd.f32 %v639_v45, %v638_v18 }
 0x35f   :  { %v689_v29 = vadd.f32 %v688_v51, %v687_v1 }
 0x360   :  { %v603_v47 = vpop.permute.xlu0 %602  ;;  %v641_v2 = vrot.slane %v640_v54, 2 }
 0x361   :  { %v632_v48 = vmul.f32 %v603_v47, %v584_v42  ;;  %v713_v3 = vperm.slane %v603_v47, %v1150_v22  ;;  %v690_v18 = vrot.slane %v689_v29, 2  ;;  %v651_v47 = vadd.f32 %v650_v31, %v649_v21 }
 0x362   :  { %v642_v8 = vadd.f32 %v641_v2, %v640_v54 }
 0x363   :  { %v652_v55 = vsel %vm141_vm1, %v632_v48, 0.0  ;;  %v720_v12 = vsel %vm336_vm3, %v713_v3, %v719_v15  ;;  %v664_v48 = vrot.slane %v663_v36, 1  ;;  %v691_v46 = vadd.f32 %v690_v18, %v689_v29 }
 0x364   :  { %v653_v58 = vrot.slane %v652_v55, 4  ;;  %v721_v59 = vsel %vm338_vm4, %v714_v23, %v720_v12  ;;  %v643_v56 = vrot.slane %v642_v8, 1 }
 0x365   :  { %v665_v57 = vadd.f32 %v664_v48, %v663_v36 }
 0x366   :  { %v654_v0 = vadd.f32 %v653_v58, %v652_v55  ;;  %v644_v41 = vadd.f32 %v643_v56, %v642_v8  ;;  %v678_v58 = vrot.slane %v677_v49, 1 }
 0x368   :  { %v655_v9 = vrot.slane %v654_v0, 2  ;;  %v613_v50 = vpop.permute.xlu0 %612  ;;  %v702_v52 = vsel %vm334_vm2, %v651_v47, %v644_v41  ;;  %v679_v1 = vadd.f32 %v678_v58, %v677_v49  ;;  %vm1388_vm2 = vmmov %vm1385_vm8 }
 0x369   :  { %v634_v11 = vmul.f32 %v613_v50, %v586_v61  ;;  %v715_v20 = vperm.slane %v613_v50, %v1150_v22  ;;  %v692_v61 = vrot.slane %v691_v46, 1 }
 0x36a   :  { %v656_v24 = vadd.f32 %v655_v9, %v654_v0 }
 0x36b   :  { %v666_v16 = vsel %vm141_vm1, %v634_v11, 0.0  ;;  %v722_v26 = vsel %vm340_vm5, %v715_v20, %v721_v59  ;;  %v693_v3 = vadd.f32 %v692_v61, %v691_v46 }
 0x36c   :  { %v667_v17 = vrot.slane %v666_v16, 4  ;;  %v657_v33 = vrot.slane %v656_v24, 1  ;;  %v723_v35 = vsel %vm342_vm6, %v716_v32, %v722_v26 }
 0x36e   :  { %v668_v14 = vadd.f32 %v667_v17, %v666_v16  ;;  %v658_v44 = vadd.f32 %v657_v33, %v656_v24 }
 0x370   :  { %v669_v34 = vrot.slane %v668_v14, 2  ;;  %v623_v30 = vpop.permute.xlu0 %622  ;;  %v703_v53 = vsel %vm336_vm3, %v658_v44, %v702_v52  ;;  %vm1389_vm3 = vmmov %vm1386_vm13 }
 0x371   :  { %v636_v38 = vmul.f32 %v623_v30, %v588_v28  ;;  %v717_v39 = vperm.slane %v623_v30, %v1150_v22  ;;  %v704_v62 = vsel %vm338_vm4, %v665_v57, %v703_v53 }
 0x372   :  { %v670_v19 = vadd.f32 %v669_v34, %v668_v14 }
 0x373   :  { %v680_v42 = vsel %vm141_vm1, %v636_v38, 0.0  ;;  %v724_v43 = vsel %vm1385_vm8, %v717_v39, %v723_v35 }
 0x374   :  { %v671_v7 = vrot.slane %v670_v19, 1  ;;  %v681_v45 = vrot.slane %v680_v42, 4  ;;  %v725_v6 = vsel %vm1386_vm13, %v718_v40, %v724_v43 }
 0x375   :  { %727 = vst.msk [vmem:[#allocation12] sm:$0xff] %vm1387_vm9, %v725_v6 }
 0x376   :  { %v682_v22 = vadd.f32 %v681_v45, %v680_v42  ;;  %749 = dma.vmem_to_hbm [thread:$0]  %s745_s11, 128, %s747_s14, [#allocation13]   ;;  %v672_v54 = vadd.f32 %v671_v7, %v670_v19 }
 0x378   :  { %v683_v55 = vrot.slane %v682_v22, 2  ;;  %v705_v0 = vsel %vm340_vm5, %v672_v54, %v704_v62 }
 0x379   :  { %v706_v4 = vsel %vm342_vm6, %v679_v1, %v705_v0 }
 0x37a   :  { %v684_v60 = vadd.f32 %v683_v55, %v682_v22 }
 0x37c   :  { %v685_v63 = vrot.slane %v684_v60, 1 }
 0x37e   :  { %v686_v2 = vadd.f32 %v685_v63, %v684_v60 }
 0x380   :  { %v707_v5 = vsel %vm1388_vm2, %v686_v2, %v706_v4 }
 0x381   :  { %v708_v9 = vsel %vm1389_vm3, %v693_v3, %v707_v5 }
 0x382   :  { %710 = vst.msk [vmem:[#allocation11] sm:$0xff] %vm141_vm1, %v708_v9 }
 0x383   :  { %738 = dma.vmem_to_hbm [thread:$0]  %s734_s15, 128, %s736_s18, [#allocation5]  }
 0x384   :  { %1021 = dma.done.wait [#allocation5], 128  }
 0x385   :  { %1022 = vsyncadd [#allocation5], 4294967168 }
 0x386   :  { %1023 = dma.done.wait [#allocation13], 128  }
 0x387   :  { %1024 = vsyncadd [#allocation13], 4294967168 }
 0x388   :  { %758 = vsyncpa [#allocation4], 1 }
 0x389   :  { %759 = vsyncpa [#allocation7], 1 }
 0x38a   :  { %760 = vsyncpa [#allocation10], 1 }
 0x38b   :  { %761 = vsyncpa [#allocation5], 1 }
 0x38c   :  { %762 = vsyncpa [#allocation13], 1 }

// kernel: tpu_custom_call.1
= control target key start
LH: loop header
LB: loop body
LE: loop exit
PB: predicated region body
PF: predicated region fallthrough
CT: control target
= control target key end

     0   :  { %s1368_s0 = inlined_call_operand.hbm [shape: bf16[8,8,32], index: 0, kind: input, shape index: {}]   ;;  %s1369_s1 = inlined_call_operand.hbm [shape: bf16[8,16], index: 1, kind: input, shape index: {}]   ;;  %s1370_s2 = inlined_call_operand.hbm [shape: bf16[32,32], index: 2, kind: input, shape index: {}]   ;;  %s1371_s3 = inlined_call_operand.vmem [shape: f32[1,32], index: 3, kind: input, shape index: {}]   ;;  %s1372_s4 = inlined_call_operand.hbm [shape: bf16[16,32], index: 4, kind: input, shape index: {}]   ;;  %s1373_s5 = inlined_call_operand.vmem [shape: f32[1,32], index: 5, kind: input, shape index: {}]   ;;  %s1374_s6 = inlined_call_operand.vmem [shape: f32[1,32], index: 6, kind: input, shape index: {}]   ;;  %s1375_s7 = inlined_call_operand.<no memory space> [shape: f32[1,1], index: 7, kind: input, shape index: {}]   ;;  %s1376_s8 = inlined_call_operand.hbm [shape: f32[8,32], index: 8, kind: output, shape index: {0}]   ;;  %s1377_s9 = inlined_call_operand.hbm [shape: f32[8,8], index: 9, kind: output, shape index: {1}]  }
   0x1   :  { %v15_v0 = vstv %s1375_s7 }
   0x2   :  { %16 = vst [vmem:[#allocation2] sm:$0x1] %v15_v0 }
   0x3   :  { %17 = vsyncpa [#allocation4], 0 }
   0x4   :  { %18 = vsyncpa [#allocation7], 0 }
   0x5   :  { %19 = vsyncpa [#allocation10], 0 }
   0x6   :  { %20 = vsyncpa [#allocation5], 0  ;;  %s40_s13 = sshll.u32 %s1369_s1, 4  ;;  %s41_s13 = int_to_ptr.hbm [resolvable:$true] %s40_s13 }
   0x7   :  { %21 = vsyncpa [#allocation13], 0  ;;  %s1025_s14 = smov [#allocation6]   ;;  %s26_s18 = sshll.u32 %s1368_s0, 4  ;;  %s27_s18 = int_to_ptr.hbm [resolvable:$true] %s26_s18 }
   0x8   :  { %s42_s15 = sshll.u32 %s1025_s14, 4  ;;  %s1026_s7 = smov [#allocation3]   ;;  %s43_s15 = int_to_ptr.vmem [resolvable:$true] %s42_s15 }
   0x9   :  { %45 = dma.hbm_to_vmem [thread:$0]  %s41_s13, 64, %s43_s15, [#allocation7]  }
   0xa   :  { %s28_s19 = sshll.u32 %s1026_s7, 4  ;;  %s1027_s20 = smov 64   ;;  %s29_s19 = int_to_ptr.vmem [resolvable:$true] %s28_s19 }
   0xb   :  { %s1028_s21 = smov 4   ;;  %s50_s1 = sshll.u32 %s1370_s2, 4  ;;  %s51_s1 = int_to_ptr.hbm [resolvable:$true] %s50_s1 }
   0xc   :  { %34 = dma.hbm_to_vmem [thread:$0]  %s27_s18, 512, %s29_s19, [#allocation4], %s1027_s20, %s1027_s20, %s1028_s21  }
   0xd   :  { %s1029_s24 = smov [#allocation8]   ;;  %s65_s0 = sshll.u32 %s1372_s4, 4  ;;  %s66_s0 = int_to_ptr.hbm [resolvable:$true] %s65_s0 }
   0xe   :  { %s52_s25 = sshll.u32 %s1029_s24, 4  ;;  %s1030_s28 = smov [#allocation9]   ;;  %s53_s25 = int_to_ptr.vmem [resolvable:$true] %s52_s25 }
   0xf   :  { %58 = dma.hbm_to_vmem [thread:$0]  %s51_s1, 256, %s53_s25, [#allocation7], %s1027_s20, %s1027_s20, %s1028_s21  }
  0x10   :  { %s67_s29 = sshll.u32 %s1030_s28, 4  ;;  %s68_s29 = int_to_ptr.vmem [resolvable:$true] %s67_s29 }
  0x11   :  { %73 = dma.hbm_to_vmem [thread:$0]  %s66_s0, 128, %s68_s29, [#allocation10], %s1027_s20, %s1027_s20, %s1028_s21  }
  0x12   :  { %1015 = dma.done.wait [#allocation4], 512  }
  0x13   :  { %1016 = vsyncadd [#allocation4], 4294966784 }
  0x14   :  { %1017 = dma.done.wait [#allocation7], 320  }
  0x15   :  { %1018 = vsyncadd [#allocation7], 4294966976 }
  0x16   :  { %1019 = dma.done.wait [#allocation10], 128  }
  0x17   :  { %1020 = vsyncadd [#allocation10], 4294967168  ;;  %v801_v1 = vld [vmem:[#allocation8 + $0x8] sm:$0xff]  ;;  %v802_v2 = vld [vmem:[#allocation9] sm:$0xff]  ;;  %vm208_vm0 = vcmask 130048   ;;  %vm141_vm1 = vcmask 261120  }
  0x18   :  { %160 = vmatpush.bf16.msra.mxu0 %v801_v1  ;;  %803 = vmatpush.bf16.msra.mxu2 %v801_v1  ;;  %v800_v3 = vld [vmem:[#allocation8] sm:$0xff]  ;;  %v195_v4 = vld [vmem:[#allocation6] sm:$0xf]  ;;  %v799_v7 = vld [vmem:[#allocation3 + $0x18] sm:$0xff]  ;;  %v1031_v23 = vmov 0   ;;  %vm334_vm2 = vcmask 1041409  }
  0x19   :  { %804 = vmatpush.bf16.msra.mxu3 %v801_v1  ;;  %219 = vmatpush.bf16.msra.mxu1 %v802_v2  ;;  %v796_v5 = vld [vmem:[#allocation3] sm:$0xff]  ;;  %v797_v6 = vld [vmem:[#allocation3 + $0x8] sm:$0xff]  ;;  %v798_v8 = vld [vmem:[#allocation3 + $0x10] sm:$0xff]  ;;  %vm336_vm3 = vcmask 1042434   ;;  %vm338_vm4 = vcmask 1043459   ;;  %vm340_vm5 = vcmask 1044484  }
  0x1a   :  { %v819_v9 = vld [vmem:[%s1373_s5] ss:$0 sm:$0xff]  ;;  %816 = vset.pattern.permute.xlu1 %v1031_v23  ;;  %818 = vset.pattern.permute.xlu2 %v1031_v23  ;;  %vm342_vm6 = vcmask 1045509   ;;  %vm1380_vm7 = vcmask 1046534   ;;  %vm1379_vm8 = vcmask 1047559   ;;  %vm1378_vm9 = vcmask 64512  }
  0x1b   :  { %v1109_v11 = vld [vmem:[%s1371_s3] ss:$0 sm:$0xff]  ;;  %817 = vset.pattern.permute.xlu0 %v1031_v23  ;;  %s746_s14 = sshll.u32 %s1377_s9, 4  ;;  %s1033_s9 = smov [#allocation11]   ;;  %s747_s14 = int_to_ptr.hbm [resolvable:$true] %s746_s14 }
  0x1c   :  { %795 = vmatmul.msk.bf16.vlgmr.msra.gmra.mxu1 %vm208_vm0, %v195_v4  ;;  %161 = vmatpush.bf16.msra.mxu0 %v800_v3  ;;  %v1121_v26 = vld [vmem:[%s1374_s6] ss:$0 sm:$0xff]  ;;  %s1032_s6 = smov [#allocation12]   ;;  %s733_s15 = sshll.u32 %s1033_s9, 4  ;;  %s734_s15 = int_to_ptr.vmem [resolvable:$true] %s733_s15 }
  0x1d   :  { %805 = vmatpush.bf16.msra.mxu2 %v800_v3  ;;  %806 = vmatpush.bf16.msra.mxu3 %v800_v3  ;;  %s744_s11 = sshll.u32 %s1032_s6, 4  ;;  %s735_s18 = sshll.u32 %s1376_s8, 4  ;;  %s745_s11 = int_to_ptr.vmem [resolvable:$true] %s744_s11  ;;  %s736_s18 = int_to_ptr.hbm [resolvable:$true] %s735_s18 }
  0x1f   :  { %787 = vmatmul.msk.bf16.vlgmr.msra.gmra.mxu0 %vm141_vm1, %v796_v5 }
  0x20   :  { %788 = vmatmul.msk.bf16.vlgmr.msra.gmra.mxu2 %vm141_vm1, %v797_v6  ;;  %790 = vmatmul.msk.bf16.vlgmr.msra.gmra.mxu3 %vm141_vm1, %v799_v7 }
  0x30   :  { %789 = vmatmul.msk.bf16.gmra.mxu2 %vm141_vm1, %v798_v8 }
  0x99   :  { %v221_v10 = vpop.f32.mrf.mxu1 }
  0x9a   :  { %v1111_v12 = vadd.f32 %v819_v9, %v221_v10  ;;  %v822_v10 = vld [vmem:[#allocation2] ss:$0 sm:$0xff] }
  0x9c   :  { %v163_v13 = vpop.f32.mrf.mxu0  ;;  %v233_v14 = vperm.slane %v1111_v12, 0  ;;  %v227_v16 = vrot.slane %v1111_v12, 2  ;;  %v226_v18 = vrot.slane %v1111_v12, 1  ;;  %v228_v31 = vrot.slane %v1111_v12, 3 }
  0x9d   :  { %v187_v15 = vadd.f32 %v1109_v11, %v163_v13  ;;  %v231_v42 = vrot.slane %v1111_v12, 6  ;;  %v229_v43 = vrot.slane %v1111_v12, 4  ;;  %v230_v56 = vrot.slane %v1111_v12, 5 }
  0x9e   :  { %v235_v20 = vperm.slane %v227_v16, 0  ;;  %v234_v22 = vperm.slane %v226_v18, 0  ;;  %v236_v36 = vperm.slane %v228_v31, 0  ;;  %v232_v59 = vrot.slane %v1111_v12, 7 }
  0x9f   :  { %v249_v17 = vadd.f32 %v233_v14, %v187_v15  ;;  %v239_v49 = vperm.slane %v231_v42, 0  ;;  %v237_v51 = vperm.slane %v229_v43, 0  ;;  %v238_v63 = vperm.slane %v230_v56, 0 }
  0xa0   :  { %v240_v1 = vperm.slane %v232_v59, 0 }
  0xa1   :  { %823 = vtanh.f32 %v249_v17  ;;  %v223_v19 = vpop.f32.mrf.mxu1 }
  0xa3   :  { %v168_v21 = vpop.f32.mrf.mxu2  ;;  %v178_v39 = vpop.f32.mrf.mxu3 }
  0xa4   :  { %v189_v24 = vadd.f32 %v1109_v11, %v168_v21  ;;  %v165_v25 = vpop.f32.mrf.mxu0  ;;  %v193_v48 = vadd.f32 %v1109_v11, %v178_v39  ;;  %v324_v21 = vlaneseq }
  0xa5   :  { %v188_v27 = vadd.f32 %v1109_v11, %v165_v25 }
  0xa6   :  { %v251_v28 = vadd.f32 %v235_v20, %v189_v24  ;;  %v255_v55 = vadd.f32 %v239_v49, %v193_v48 }
  0xa7   :  { %v824_v29 = vpop.eup %823  ;;  %v250_v30 = vadd.f32 %v234_v22, %v188_v27  ;;  %v1150_v22 = vand.u32 127, %v324_v21 }
  0xa8   :  { %825 = vtanh.f32 %v251_v28  ;;  %v269_v32 = vmul.f32 %v824_v29, %v1121_v26 }
  0xa9   :  { %827 = vtanh.f32 %v250_v30 }
  0xaa   :  { %v277_v33 = vsel %vm141_vm1, %v269_v32, 0.0 }
  0xab   :  { %v170_v34 = vpop.f32.mrf.mxu2  ;;  %278 = vadd.xlane.f32.xlu0 %v277_v33  ;;  %v180_v57 = vpop.f32.mrf.mxu3 }
  0xac   :  { %v190_v35 = vadd.f32 %v1109_v11, %v170_v34  ;;  %v194_v61 = vadd.f32 %v1109_v11, %v180_v57 }
  0xae   :  { %v826_v37 = vpop.eup %825  ;;  %v252_v38 = vadd.f32 %v236_v36, %v190_v35  ;;  %v256_v4 = vadd.f32 %v240_v1, %v194_v61 }
  0xaf   :  { %v271_v40 = vmul.f32 %v826_v37, %v1121_v26  ;;  %v828_v41 = vpop.eup %827 }
  0xb0   :  { %829 = vtanh.f32 %v252_v38  ;;  %v270_v45 = vmul.f32 %v828_v41, %v1121_v26 }
  0xb1   :  { %v283_v44 = vsel %vm141_vm1, %v271_v40, 0.0 }
  0xb2   :  { %284 = vadd.xlane.f32.xlu1 %v283_v44  ;;  %v280_v47 = vsel %vm141_vm1, %v270_v45, 0.0 }
  0xb3   :  { %v173_v46 = vpop.f32.mrf.mxu2  ;;  %281 = vadd.xlane.f32.xlu0 %v280_v47 }
  0xb4   :  { %v191_v50 = vadd.f32 %v1109_v11, %v173_v46 }
  0xb6   :  { %v830_v52 = vpop.eup %829  ;;  %v253_v53 = vadd.f32 %v237_v51, %v191_v50 }
  0xb7   :  { %v272_v54 = vmul.f32 %v830_v52, %v1121_v26 }
  0xb8   :  { %831 = vtanh.f32 %v253_v53 }
  0xb9   :  { %v286_v58 = vsel %vm141_vm1, %v272_v54, 0.0  ;;  %833 = vtanh.f32 %v255_v55 }
  0xba   :  { %287 = vadd.xlane.f32.xlu2 %v286_v58 }
  0xbb   :  { %v175_v60 = vpop.f32.mrf.mxu2 }
  0xbc   :  { %v192_v62 = vadd.f32 %v1109_v11, %v175_v60 }
  0xbe   :  { %v832_v0 = vpop.eup %831  ;;  %v254_v2 = vadd.f32 %v238_v63, %v192_v62 }
  0xbf   :  { %v273_v3 = vmul.f32 %v832_v0, %v1121_v26  ;;  %v834_v6 = vpop.eup %833 }
  0xc0   :  { %835 = vtanh.f32 %v254_v2  ;;  %v275_v7 = vmul.f32 %v834_v6, %v1121_v26 }
  0xc1   :  { %v289_v5 = vsel %vm141_vm1, %v273_v3, 0.0  ;;  %837 = vtanh.f32 %v256_v4 }
  0xc2   :  { %290 = vadd.xlane.f32.xlu2 %v289_v5  ;;  %v295_v11 = vsel %vm141_vm1, %v275_v7, 0.0 }
  0xc6   :  { %v836_v8 = vpop.eup %835 }
  0xc7   :  { %v274_v9 = vmul.f32 %v836_v8, %v1121_v26  ;;  %v838_v13 = vpop.eup %837 }
  0xc8   :  { %v276_v14 = vmul.f32 %v838_v13, %v1121_v26 }
  0xc9   :  { %v292_v12 = vsel %vm141_vm1, %v274_v9, 0.0 }
  0xca   :  { %296 = vadd.xlane.f32.xlu2 %v295_v11  ;;  %293 = vadd.xlane.f32.xlu0 %v292_v12  ;;  %v298_v15 = vsel %vm141_vm1, %v276_v14, 0.0 }
  0xcb   :  { %305 = vperm.xlu1 %816, %v822_v10  }
  0xd2   :  { %299 = vadd.xlane.f32.xlu0 %v298_v15 }
 0x11e   :  { %v279_v16 = vpop.xlane.xlu0 %278 }
 0x125   :  { %v285_v18 = vpop.xlane.xlu1 %284 }
 0x126   :  { %v282_v19 = vpop.xlane.xlu0 %281 }
 0x12d   :  { %v288_v17 = vpop.xlane.xlu2 %287 }
 0x135   :  { %v291_v20 = vpop.xlane.xlu2 %290 }
 0x13d   :  { %v306_v23 = vpop.permute.xlu1 %305  ;;  %v294_v27 = vpop.xlane.xlu0 %293 }
 0x13e   :  { %v308_v24 = vadd.f32 %v306_v23, %v279_v16  ;;  %v309_v25 = vadd.f32 %v306_v23, %v282_v19  ;;  %v310_v28 = vadd.f32 %v306_v23, %v285_v18  ;;  %v311_v29 = vadd.f32 %v306_v23, %v288_v17  ;;  %v297_v33 = vpop.xlane.xlu2 %296 }
 0x13f   :  { %v312_v30 = vadd.f32 %v306_v23, %v291_v20  ;;  %v313_v34 = vadd.f32 %v306_v23, %v294_v27  ;;  %v314_v39 = vadd.f32 %v306_v23, %v297_v33 }
 0x140   :  { %v326_v26 = vperm.slane %v308_v24, %v1150_v22  ;;  %v327_v31 = vperm.slane %v309_v25, %v1150_v22  ;;  %v328_v32 = vperm.slane %v310_v28, %v1150_v22  ;;  %v329_v35 = vperm.slane %v311_v29, %v1150_v22 }
 0x141   :  { %v330_v37 = vperm.slane %v312_v30, %v1150_v22  ;;  %v331_v41 = vperm.slane %v313_v34, %v1150_v22  ;;  %v332_v46 = vperm.slane %v314_v39, %v1150_v22 }
 0x142   :  { %v335_v36 = vsel %vm334_vm2, %v327_v31, %v326_v26 }
 0x143   :  { %v337_v38 = vsel %vm336_vm3, %v328_v32, %v335_v36 }
 0x144   :  { %v339_v40 = vsel %vm338_vm4, %v329_v35, %v337_v38 }
 0x145   :  { %v341_v42 = vsel %vm340_vm5, %v330_v37, %v339_v40  ;;  %v300_v43 = vpop.xlane.xlu0 %299 }
 0x146   :  { %v315_v44 = vadd.f32 %v306_v23, %v300_v43  ;;  %v343_v45 = vsel %vm342_vm6, %v331_v41, %v341_v42 }
 0x147   :  { %v345_v48 = vsel %vm1380_vm7, %v332_v46, %v343_v45 }
 0x148   :  { %v333_v47 = vperm.slane %v315_v44, %v1150_v22 }
 0x14a   :  { %v347_v49 = vsel %vm1379_vm8, %v333_v47, %v345_v48 }
 0x14b   :  { %v350_v50 = vsel %vm1378_vm9, %v347_v49, -inf }
 0x14c   :  { %351 = vmax.xlane.f32.xlu2 %v350_v50 }
 0x1bf   :  { %v352_v51 = vpop.xlane.xlu2 %351 }
 0x1c0   :  { %v356_v52 = vperm.slane %v352_v51, 2  ;;  %v355_v53 = vperm.slane %v352_v51, 1  ;;  %v354_v54 = vperm.slane %v352_v51, 0  ;;  %v357_v58 = vperm.slane %v352_v51, 3 }
 0x1c1   :  { %v359_v59 = vperm.slane %v352_v51, 5  ;;  %v358_v2 = vperm.slane %v352_v51, 4  ;;  %v361_v4 = vperm.slane %v352_v51, 7  ;;  %v360_v11 = vperm.slane %v352_v51, 6 }
 0x1c2   :  { %v372_v55 = vsub.f32 %v310_v28, %v356_v52  ;;  %v371_v56 = vsub.f32 %v309_v25, %v355_v53  ;;  %v370_v57 = vsub.f32 %v308_v24, %v354_v54  ;;  %v373_v63 = vsub.f32 %v311_v29, %v357_v58 }
 0x1c3   :  { %v375_v0 = vsub.f32 %v313_v34, %v359_v59  ;;  %v374_v8 = vsub.f32 %v312_v30, %v358_v2  ;;  %v377_v9 = vsub.f32 %v315_v44, %v361_v4  ;;  %v376_v15 = vsub.f32 %v314_v39, %v360_v11 }
 0x1c4   :  { %v382_v60 = vmul.f32 1.442695, %v372_v55  ;;  %v380_v61 = vmul.f32 1.442695, %v371_v56  ;;  %v378_v62 = vmul.f32 1.442695, %v370_v57 }
 0x1c5   :  { %v384_v1 = vmul.f32 1.442695, %v373_v63  ;;  %v388_v3 = vmul.f32 1.442695, %v375_v0  ;;  %v386_v10 = vmul.f32 1.442695, %v374_v8 }
 0x1c6   :  { %839 = vpow2.f32 %v382_v60  ;;  %v392_v12 = vmul.f32 1.442695, %v377_v9  ;;  %v390_v16 = vmul.f32 1.442695, %v376_v15 }
 0x1c7   :  { %841 = vpow2.f32 %v380_v61 }
 0x1c8   :  { %843 = vpow2.f32 %v378_v62 }
 0x1c9   :  { %845 = vpow2.f32 %v384_v1 }
 0x1ca   :  { %847 = vpow2.f32 %v388_v3 }
 0x1cb   :  { %849 = vpow2.f32 %v386_v10 }
 0x1cc   :  { %v1168_v5 = vpop.eup %839  ;;  %851 = vpow2.f32 %v392_v12 }
 0x1cd   :  { %v1170_v6 = vpop.eup %841  ;;  %409 = vperm.xlu1 %816, %v1168_v5   ;;  %853 = vpow2.f32 %v390_v16 }
 0x1ce   :  { %v1173_v7 = vpop.eup %843  ;;  %406 = vperm.xlu2 %818, %v1170_v6  }
 0x1cf   :  { %403 = vperm.xlu0 %817, %v1173_v7   ;;  %v1177_v13 = vpop.eup %845 }
 0x1d0   :  { %v1179_v14 = vpop.eup %847 }
 0x1d1   :  { %v1183_v17 = vpop.eup %849 }
 0x1d2   :  { %v1185_v18 = vpop.eup %851 }
 0x1d3   :  { %v1189_v19 = vpop.eup %853 }
 0x1d5   :  { %412 = vperm.xlu1 %816, %v1177_v13  }
 0x1d6   :  { %418 = vperm.xlu2 %818, %v1179_v14  }
 0x1dd   :  { %415 = vperm.xlu1 %816, %v1183_v17  }
 0x1de   :  { %424 = vperm.xlu2 %818, %v1185_v18  }
 0x1e5   :  { %421 = vperm.xlu1 %816, %v1189_v19  }
 0x228   :  { %v407_v21 = vpop.permute.xlu2 %406 }
 0x229   :  { %v427_v28 = vperm.slane %v407_v21, %v1150_v22 }
 0x230   :  { %v419_v25 = vpop.permute.xlu2 %418 }
 0x231   :  { %v431_v37 = vperm.slane %v419_v25, %v1150_v22 }
 0x238   :  { %v425_v35 = vpop.permute.xlu2 %424 }
 0x239   :  { %v433_v40 = vperm.slane %v425_v35, %v1150_v22 }
 0x23f   :  { %v410_v20 = vpop.permute.xlu1 %409 }
 0x240   :  { %v428_v30 = vperm.slane %v410_v20, %v1150_v22 }
 0x241   :  { %v404_v24 = vpop.permute.xlu0 %403 }
 0x242   :  { %v426_v27 = vperm.slane %v404_v24, %v1150_v22 }
 0x244   :  { %v434_v26 = vsel %vm334_vm2, %v427_v28, %v426_v27 }
 0x245   :  { %v435_v33 = vsel %vm336_vm3, %v428_v30, %v434_v26 }
 0x247   :  { %v413_v23 = vpop.permute.xlu1 %412 }
 0x248   :  { %v429_v31 = vperm.slane %v413_v23, %v1150_v22 }
 0x24a   :  { %v436_v34 = vsel %vm338_vm4, %v429_v31, %v435_v33 }
 0x24f   :  { %v416_v29 = vpop.permute.xlu1 %415 }
 0x250   :  { %v430_v32 = vperm.slane %v416_v29, %v1150_v22 }
 0x252   :  { %v437_v36 = vsel %vm340_vm5, %v430_v32, %v436_v34 }
 0x253   :  { %v438_v41 = vsel %vm342_vm6, %v431_v37, %v437_v36 }
 0x257   :  { %v422_v38 = vpop.permute.xlu1 %421 }
 0x258   :  { %v432_v39 = vperm.slane %v422_v38, %v1150_v22 }
 0x25a   :  { %v439_v42 = vsel %vm1380_vm7, %v432_v39, %v438_v41 }
 0x25b   :  { %v440_v43 = vsel %vm1379_vm8, %v433_v40, %v439_v42 }
 0x25c   :  { %v442_v44 = vsel %vm1378_vm9, %v440_v43, 0.0 }
 0x25d   :  { %443 = vadd.xlane.f32.xlu1 %v442_v44 }
 0x2d0   :  { %v444_v45 = vpop.xlane.xlu1 %443 }
 0x2d1   :  { %v446_v46 = vperm.slane %v444_v45, 0  ;;  %v447_v47 = vperm.slane %v444_v45, 1  ;;  %v1208_v48 = vperm.slane %v444_v45, 2  ;;  %v1210_v49 = vperm.slane %v444_v45, 3 }
 0x2d2   :  { %v1212_v50 = vperm.slane %v444_v45, 4  ;;  %v1214_v51 = vperm.slane %v444_v45, 5  ;;  %v1220_v56 = vperm.slane %v444_v45, 7  ;;  %v1222_v59 = vperm.slane %v444_v45, 6 }
 0x2d3   :  { %855 = vrcp.f32 %v446_v46  ;;  %v486_v52 = vand.u32 2147483647, %v447_v47  ;;  %v488_v53 = vand.u32 2147483648, %v447_v47  ;;  %v471_v54 = vand.u32 2147483647, %v446_v46 }
 0x2d4   :  { %857 = vrcp.f32 %v447_v47  ;;  %v473_v57 = vand.u32 2147483648, %v446_v46  ;;  %vm482_vm10 = vweird.f32 %v447_v47  ;;  %vm467_vm12 = vweird.f32 %v446_v46 }
 0x2d5   :  { %859 = vrcp.f32 %v1208_v48  ;;  %vm1226_vm11 = vcmp.eq.f32.partialorder %v486_v52, 8.507059e+37  ;;  %v489_v1 = vor.u32 1.1754944e-38, %v488_v53  ;;  %vm1232_vm13 = vcmp.eq.f32.partialorder %v471_v54, 8.507059e+37 }
 0x2d6   :  { %861 = vrcp.f32 %v1210_v49  ;;  %v474_v10 = vor.u32 1.1754944e-38, %v473_v57  ;;  %v518_v27 = vand.u32 2147483648, %v1210_v49  ;;  %v503_v29 = vand.u32 2147483648, %v1208_v48 }
 0x2d7   :  { %863 = vrcp.f32 %v1212_v50  ;;  %v501_v41 = vand.u32 2147483647, %v1208_v48  ;;  %v516_v43 = vand.u32 2147483647, %v1210_v49  ;;  %v548_v53 = vand.u32 2147483648, %v1214_v51 }
 0x2d8   :  { %865 = vrcp.f32 %v1214_v51  ;;  %v531_v63 = vand.u32 2147483647, %v1212_v50 }
 0x2d9   :  { %v856_v55 = vpop.eup %855  ;;  %867 = vrcp.f32 %v1220_v56 }
 0x2da   :  { %v858_v58 = vpop.eup %857  ;;  %v463_v60 = vmul.f32 %v856_v55, %v446_v46  ;;  %vm468_vm14 = vweird.f32 %v856_v55  ;;  %869 = vrcp.f32 %v1222_v59  ;;  %v504_v46 = vor.u32 1.1754944e-38, %v503_v29 }
 0x2db   :  { %v1224_v61 = vpop.eup %859  ;;  %v478_v62 = vmul.f32 %v858_v58, %v447_v47  ;;  %vm483_vm15 = vweird.f32 %v858_v58  ;;  %vm469_vm0 = vmor %vm467_vm12, %vm468_vm14  ;;  %vm512_vm12 = vweird.f32 %v1210_v49 }
 0x2dc   :  { %v1230_v0 = vpop.eup %861  ;;  %v464_v2 = vsub.f32 1.0, %v463_v60  ;;  %v493_v4 = vmul.f32 %v1224_v61, %v1208_v48  ;;  %vm498_vm9 = vweird.f32 %v1224_v61  ;;  %vm484_vm8 = vmor %vm482_vm10, %vm483_vm15  ;;  %vm497_vm10 = vweird.f32 %v1208_v48 }
 0x2dd   :  { %v1238_v8 = vpop.eup %863  ;;  %v479_v9 = vsub.f32 1.0, %v478_v62  ;;  %v508_v11 = vmul.f32 %v1230_v0, %v1210_v49  ;;  %vm513_vm7 = vweird.f32 %v1230_v0  ;;  %v519_v49 = vor.u32 1.1754944e-38, %v518_v27 }
 0x2de   :  { %v1243_v12 = vpop.eup %865  ;;  %v465_v15 = vmul.f32 %v856_v55, %v464_v2  ;;  %v494_v16 = vsub.f32 1.0, %v493_v4  ;;  %v523_v20 = vmul.f32 %v1238_v8, %v1212_v50  ;;  %v533_v60 = vand.u32 2147483648, %v1212_v50 }
 0x2df   :  { %v480_v21 = vmul.f32 %v858_v58, %v479_v9  ;;  %v509_v23 = vsub.f32 1.0, %v508_v11  ;;  %v538_v24 = vmul.f32 %v1243_v12, %v1214_v51  ;;  %v1259_v34 = vpop.eup %867  ;;  %vm543_vm14 = vweird.f32 %v1243_v12 }
 0x2e0   :  { %v466_v25 = vadd.f32 %v856_v55, %v465_v15  ;;  %v495_v28 = vmul.f32 %v1224_v61, %v494_v16  ;;  %v524_v33 = vsub.f32 1.0, %v523_v20  ;;  %v1278_v45 = vpop.eup %869  ;;  %v568_v48 = vmul.f32 %v1259_v34, %v1220_v56 }
 0x2e1   :  { %v481_v30 = vadd.f32 %v858_v58, %v480_v21  ;;  %v510_v26 = vmul.f32 %v1230_v0, %v509_v23  ;;  %v539_v38 = vsub.f32 1.0, %v538_v24  ;;  %v553_v57 = vmul.f32 %v1278_v45, %v1222_v59 }
 0x2e2   :  { %v470_v31 = vsel %vm469_vm0, %v856_v55, %v466_v25  ;;  %v496_v32 = vadd.f32 %v1224_v61, %v495_v28  ;;  %vm527_vm15 = vweird.f32 %v1212_v50  ;;  %vm542_vm0 = vweird.f32 %v1214_v51 }
 0x2e3   :  { %v485_v35 = vsel %vm484_vm8, %v858_v58, %v481_v30  ;;  %v475_v36 = vsel %vm1232_vm13, %v474_v10, %v470_v31  ;;  %v511_v37 = vadd.f32 %v1230_v0, %v510_v26  ;;  %vm499_vm8 = vmor %vm497_vm10, %vm498_vm9  ;;  %v540_v47 = vmul.f32 %v1243_v12, %v539_v38  ;;  %v98_v26 = vld [vmem:[#allocation3 + $0x4] sm:$0xff]   ;;  %v97_v31 = vld [vmem:[#allocation3] sm:$0xf] }
 0x2e4   :  { %v490_v39 = vsel %vm1226_vm11, %v489_v1, %v485_v35  ;;  %v476_v40 = vmul.f32 %v1173_v7, %v475_v36  ;;  %vm514_vm13 = vmor %vm512_vm12, %vm513_vm7  ;;  %v500_v44 = vsel %vm499_vm8, %v1224_v61, %v496_v32  ;;  %v525_v7 = vmul.f32 %v1238_v8, %v524_v33 }
 0x2e5   :  { %v491_v42 = vmul.f32 %v1170_v6, %v490_v39  ;;  %v515_v6 = vsel %vm514_vm13, %v1230_v0, %v511_v37  ;;  %vm502_vm9 = vcmp.eq.f32.partialorder %v501_v41, 8.507059e+37  ;;  %vm517_vm11 = vcmp.eq.f32.partialorder %v516_v43, 8.507059e+37  ;;  %vm544_vm12 = vmor %vm542_vm0, %vm543_vm14 }
 0x2e6   :  { %592 = vperm.xlu0 %817, %v476_v40   ;;  %v505_v52 = vsel %vm502_vm9, %v504_v46, %v500_v44  ;;  %v520_v54 = vsel %vm517_vm11, %v519_v49, %v515_v6  ;;  %v526_v55 = vadd.f32 %v1238_v8, %v525_v7  ;;  %vm528_vm7 = vweird.f32 %v1238_v8  ;;  %v1320_v40 = vld [vmem:[#allocation3 + $0x14] sm:$0xff]  }
 0x2e7   :  { %597 = vperm.xlu2 %818, %v491_v42   ;;  %v541_v58 = vadd.f32 %v1243_v12, %v540_v47  ;;  %v569_v61 = vsub.f32 1.0, %v568_v48  ;;  %v506_v62 = vmul.f32 %v1168_v5, %v505_v52  ;;  %v554_v0 = vsub.f32 1.0, %v553_v57  ;;  %vm529_vm10 = vmor %vm527_vm15, %vm528_vm7 }
 0x2e8   :  { %v521_v1 = vmul.f32 %v1177_v13, %v520_v54  ;;  %v546_v2 = vand.u32 2147483647, %v1214_v51  ;;  %v530_v3 = vsel %vm529_vm10, %v1238_v8, %v526_v55  ;;  %v534_v9 = vor.u32 1.1754944e-38, %v533_v60 }
 0x2e9   :  { %v555_v4 = vmul.f32 %v1278_v45, %v554_v0  ;;  %v545_v5 = vsel %vm544_vm12, %v1243_v12, %v541_v58  ;;  %v570_v50 = vmul.f32 %v1259_v34, %v569_v61  ;;  %v549_v10 = vor.u32 1.1754944e-38, %v548_v53 }
 0x2ea   :  { %vm532_vm8 = vcmp.eq.f32.partialorder %v531_v63, 8.507059e+37  ;;  %vm547_vm13 = vcmp.eq.f32.partialorder %v546_v2, 8.507059e+37  ;;  %vm558_vm9 = vweird.f32 %v1278_v45  ;;  %vm573_vm11 = vweird.f32 %v1259_v34 }
 0x2eb   :  { %v535_v13 = vsel %vm532_vm8, %v534_v9, %v530_v3  ;;  %v550_v11 = vsel %vm547_vm13, %v549_v10, %v545_v5  ;;  %v556_v51 = vadd.f32 %v1278_v45, %v555_v4  ;;  %v571_v15 = vadd.f32 %v1259_v34, %v570_v50 }
 0x2ec   :  { %v563_v8 = vand.u32 2147483648, %v1222_v59  ;;  %v536_v12 = vmul.f32 %v1183_v17, %v535_v13  ;;  %v578_v16 = vand.u32 2147483648, %v1220_v56  ;;  %vm557_vm7 = vweird.f32 %v1222_v59 }
 0x2ed   :  { %v561_v20 = vand.u32 2147483647, %v1222_v59  ;;  %v551_v21 = vmul.f32 %v1179_v14, %v550_v11  ;;  %vm572_vm14 = vweird.f32 %v1220_v56  ;;  %v576_v23 = vand.u32 2147483647, %v1220_v56  ;;  %vm559_vm15 = vmor %vm557_vm7, %vm558_vm9 }
 0x2ee   :  { %602 = vperm.xlu0 %817, %v506_v62   ;;  %vm574_vm0 = vmor %vm572_vm14, %vm573_vm11  ;;  %v560_v24 = vsel %vm559_vm15, %v1278_v45, %v556_v51  ;;  %v564_v25 = vor.u32 1.1754944e-38, %v563_v8  ;;  %v579_v27 = vor.u32 1.1754944e-38, %v578_v16  ;;  %v583_v32 = vunpack.c.l.bf16 %v98_v26 }
 0x2ef   :  { %607 = vperm.xlu2 %818, %v521_v1   ;;  %v575_v17 = vsel %vm574_vm0, %v1259_v34, %v571_v15  ;;  %vm562_vm10 = vcmp.eq.f32.partialorder %v561_v20, 8.507059e+37  ;;  %vm577_vm12 = vcmp.eq.f32.partialorder %v576_v23, 8.507059e+37  ;;  %v582_v33 = vunpack.c.l.bf16 %v97_v31  ;;  %v100_v34 = vld [vmem:[#allocation3 + $0xc] sm:$0xff]  }
 0x2f0   :  { %v565_v28 = vsel %vm562_vm10, %v564_v25, %v560_v24  ;;  %v580_v59 = vsel %vm577_vm12, %v579_v27, %v575_v17  ;;  %v585_v39 = vunpack.c.l.bf16 %v100_v34  ;;  %v584_v42 = vunpack.c.h.bf16 %v98_v26 }
 0x2f1   :  { %v566_v14 = vmul.f32 %v1189_v19, %v565_v28  ;;  %v581_v29 = vmul.f32 %v1185_v18, %v580_v59  ;;  %v104_v19 = vld [vmem:[#allocation3 + $0x1c] sm:$0xf]  ;;  %v587_v44 = vunpack.c.l.bf16 %v1320_v40  ;;  %v586_v61 = vunpack.c.h.bf16 %v100_v34 }
 0x2f2   :  { %v589_v7 = vunpack.c.l.bf16 %v104_v19  ;;  %v588_v28 = vunpack.c.h.bf16 %v1320_v40  ;;  %vm1385_vm8 = vcmask 1046534   ;;  %vm1386_vm13 = vcmask 1047559  }
 0x2f3   :  { %vm1387_vm9 = vcmask 64512  }
 0x2f6   :  { %612 = vperm.xlu0 %817, %v536_v12  }
 0x2f7   :  { %617 = vperm.xlu2 %818, %v551_v21  }
 0x2fe   :  { %622 = vperm.xlu0 %817, %v566_v14  }
 0x2ff   :  { %627 = vperm.xlu2 %818, %v581_v29  }
 0x341   :  { %v598_v56 = vpop.permute.xlu2 %597 }
 0x342   :  { %v631_v37 = vmul.f32 %v598_v56, %v583_v32  ;;  %v712_v5 = vperm.slane %v598_v56, %v1150_v22 }
 0x344   :  { %v645_v41 = vsel %vm141_vm1, %v631_v37, 0.0 }
 0x345   :  { %v646_v6 = vrot.slane %v645_v41, 4 }
 0x347   :  { %v647_v57 = vadd.f32 %v646_v6, %v645_v41 }
 0x349   :  { %v608_v30 = vpop.permute.xlu2 %607  ;;  %v648_v4 = vrot.slane %v647_v57, 2 }
 0x34a   :  { %v633_v43 = vmul.f32 %v608_v30, %v585_v39  ;;  %v714_v23 = vperm.slane %v608_v30, %v1150_v22 }
 0x34b   :  { %v649_v21 = vadd.f32 %v648_v4, %v647_v57 }
 0x34c   :  { %v659_v49 = vsel %vm141_vm1, %v633_v43, 0.0 }
 0x34d   :  { %v660_v60 = vrot.slane %v659_v49, 4  ;;  %v650_v31 = vrot.slane %v649_v21, 1 }
 0x34f   :  { %v661_v10 = vadd.f32 %v660_v60, %v659_v49 }
 0x351   :  { %v1318_v35 = vpop.permute.xlu2 %617  ;;  %v662_v25 = vrot.slane %v661_v10, 2 }
 0x352   :  { %v635_v52 = vmul.f32 %v1318_v35, %v587_v44  ;;  %v716_v32 = vperm.slane %v1318_v35, %v1150_v22 }
 0x354   :  { %v673_v62 = vsel %vm141_vm1, %v635_v52, 0.0 }
 0x355   :  { %v674_v13 = vrot.slane %v673_v62, 4 }
 0x357   :  { %v675_v27 = vadd.f32 %v674_v13, %v673_v62 }
 0x358   :  { %v593_v36 = vpop.permute.xlu0 %592 }
 0x359   :  { %v630_v38 = vmul.f32 %v593_v36, %v582_v33  ;;  %v1325_v46 = vpop.permute.xlu2 %627  ;;  %v711_v63 = vperm.slane %v593_v36, %v1150_v22  ;;  %v663_v36 = vadd.f32 %v662_v25, %v661_v10  ;;  %v676_v37 = vrot.slane %v675_v27, 2 }
 0x35a   :  { %v637_v53 = vmul.f32 %v1325_v46, %v589_v7  ;;  %v718_v40 = vperm.slane %v1325_v46, %v1150_v22 }
 0x35b   :  { %v638_v18 = vsel %vm141_vm1, %v630_v38, 0.0  ;;  %v719_v15 = vsel %vm334_vm2, %v712_v5, %v711_v63  ;;  %v677_v49 = vadd.f32 %v676_v37, %v675_v27 }
 0x35c   :  { %v639_v45 = vrot.slane %v638_v18, 4  ;;  %v687_v1 = vsel %vm141_vm1, %v637_v53, 0.0 }
 0x35d   :  { %v688_v51 = vrot.slane %v687_v1, 4 }
 0x35e   :  { %v640_v54 = vadd.f32 %v639_v45, %v638_v18 }
 0x35f   :  { %v689_v29 = vadd.f32 %v688_v51, %v687_v1 }
 0x360   :  { %v603_v47 = vpop.permute.xlu0 %602  ;;  %v641_v2 = vrot.slane %v640_v54, 2 }
 0x361   :  { %v632_v48 = vmul.f32 %v603_v47, %v584_v42  ;;  %v713_v3 = vperm.slane %v603_v47, %v1150_v22  ;;  %v690_v18 = vrot.slane %v689_v29, 2  ;;  %v651_v47 = vadd.f32 %v650_v31, %v649_v21 }
 0x362   :  { %v642_v8 = vadd.f32 %v641_v2, %v640_v54 }
 0x363   :  { %v652_v55 = vsel %vm141_vm1, %v632_v48, 0.0  ;;  %v720_v12 = vsel %vm336_vm3, %v713_v3, %v719_v15  ;;  %v664_v48 = vrot.slane %v663_v36, 1  ;;  %v691_v46 = vadd.f32 %v690_v18, %v689_v29 }
 0x364   :  { %v653_v58 = vrot.slane %v652_v55, 4  ;;  %v721_v59 = vsel %vm338_vm4, %v714_v23, %v720_v12  ;;  %v643_v56 = vrot.slane %v642_v8, 1 }
 0x365   :  { %v665_v57 = vadd.f32 %v664_v48, %v663_v36 }
 0x366   :  { %v654_v0 = vadd.f32 %v653_v58, %v652_v55  ;;  %v644_v41 = vadd.f32 %v643_v56, %v642_v8  ;;  %v678_v58 = vrot.slane %v677_v49, 1 }
 0x368   :  { %v655_v9 = vrot.slane %v654_v0, 2  ;;  %v613_v50 = vpop.permute.xlu0 %612  ;;  %v702_v52 = vsel %vm334_vm2, %v651_v47, %v644_v41  ;;  %v679_v1 = vadd.f32 %v678_v58, %v677_v49  ;;  %vm1388_vm2 = vmmov %vm1385_vm8 }
 0x369   :  { %v634_v11 = vmul.f32 %v613_v50, %v586_v61  ;;  %v715_v20 = vperm.slane %v613_v50, %v1150_v22  ;;  %v692_v61 = vrot.slane %v691_v46, 1 }
 0x36a   :  { %v656_v24 = vadd.f32 %v655_v9, %v654_v0 }
 0x36b   :  { %v666_v16 = vsel %vm141_vm1, %v634_v11, 0.0  ;;  %v722_v26 = vsel %vm340_vm5, %v715_v20, %v721_v59  ;;  %v693_v3 = vadd.f32 %v692_v61, %v691_v46 }
 0x36c   :  { %v667_v17 = vrot.slane %v666_v16, 4  ;;  %v657_v33 = vrot.slane %v656_v24, 1  ;;  %v723_v35 = vsel %vm342_vm6, %v716_v32, %v722_v26 }
 0x36e   :  { %v668_v14 = vadd.f32 %v667_v17, %v666_v16  ;;  %v658_v44 = vadd.f32 %v657_v33, %v656_v24 }
 0x370   :  { %v669_v34 = vrot.slane %v668_v14, 2  ;;  %v623_v30 = vpop.permute.xlu0 %622  ;;  %v703_v53 = vsel %vm336_vm3, %v658_v44, %v702_v52  ;;  %vm1389_vm3 = vmmov %vm1386_vm13 }
 0x371   :  { %v636_v38 = vmul.f32 %v623_v30, %v588_v28  ;;  %v717_v39 = vperm.slane %v623_v30, %v1150_v22  ;;  %v704_v62 = vsel %vm338_vm4, %v665_v57, %v703_v53 }
 0x372   :  { %v670_v19 = vadd.f32 %v669_v34, %v668_v14 }
 0x373   :  { %v680_v42 = vsel %vm141_vm1, %v636_v38, 0.0  ;;  %v724_v43 = vsel %vm1385_vm8, %v717_v39, %v723_v35 }
 0x374   :  { %v671_v7 = vrot.slane %v670_v19, 1  ;;  %v681_v45 = vrot.slane %v680_v42, 4  ;;  %v725_v6 = vsel %vm1386_vm13, %v718_v40, %v724_v43 }
 0x375   :  { %727 = vst.msk [vmem:[#allocation12] sm:$0xff] %vm1387_vm9, %v725_v6 }
 0x376   :  { %v682_v22 = vadd.f32 %v681_v45, %v680_v42  ;;  %749 = dma.vmem_to_hbm [thread:$0]  %s745_s11, 128, %s747_s14, [#allocation13]   ;;  %v672_v54 = vadd.f32 %v671_v7, %v670_v19 }
 0x378   :  { %v683_v55 = vrot.slane %v682_v22, 2  ;;  %v705_v0 = vsel %vm340_vm5, %v672_v54, %v704_v62 }
 0x379   :  { %v706_v4 = vsel %vm342_vm6, %v679_v1, %v705_v0 }
 0x37a   :  { %v684_v60 = vadd.f32 %v683_v55, %v682_v22 }
 0x37c   :  { %v685_v63 = vrot.slane %v684_v60, 1 }
 0x37e   :  { %v686_v2 = vadd.f32 %v685_v63, %v684_v60 }
 0x380   :  { %v707_v5 = vsel %vm1388_vm2, %v686_v2, %v706_v4 }
 0x381   :  { %v708_v9 = vsel %vm1389_vm3, %v693_v3, %v707_v5 }
 0x382   :  { %710 = vst.msk [vmem:[#allocation11] sm:$0xff] %vm141_vm1, %v708_v9 }
 0x383   :  { %738 = dma.vmem_to_hbm [thread:$0]  %s734_s15, 128, %s736_s18, [#allocation5]  }
 0x384   :  { %1021 = dma.done.wait [#allocation5], 128  }
 0x385   :  { %1022 = vsyncadd [#allocation5], 4294967168 }
 0x386   :  { %1023 = dma.done.wait [#allocation13], 128  }
 0x387   :  { %1024 = vsyncadd [#allocation13], 4294967168 }
 0x388   :  { %758 = vsyncpa [#allocation4], 1 }
 0x389   :  { %759 = vsyncpa [#allocation7], 1 }
 0x38a   :  { %760 = vsyncpa [#allocation10], 1 }
 0x38b   :  { %761 = vsyncpa [#allocation5], 1 }
 0x38c   :  { %762 = vsyncpa [#allocation13], 1 }

</bundles_post_ra>
